<compile_context>
chip_gen: v7x
topology: tpu7x:2x2x1
jax: 0.10.0
libtpu: 0.0.40
codegen_flags: <defaults>
</compile_context>

<pallas_src>
import functools

import jax
import jax.numpy as jnp
from jax import lax
from jax.experimental import pallas as pl
from jax.experimental.pallas import tpu as pltpu

D_IN = 1024
D_HID = 512
NZ = 32            # nz for this synthetic instantiation
LEAKY_SLOPE = 0.01  # nn.LeakyReLU() default
BN_EPS = 1e-5       # nn.BatchNorm1d default
LANE = 128
TB_CAP = 1024       # batch-tile cap; fits comfortably in v5e/v6e/v7x VMEM


def _round_up(n, m):
    return (n + m - 1) // m * m


def _e_kernel(x_ref, w1_ref, gamma_ref, beta_ref, w2_ref, b2_ref, o_ref,
              sum_ref, sumsq_ref, scale_ref, shift_ref, *, inv_n):
    """Two-phase kernel over grid = (2, num_batch_tiles).

    phase 0 (p == 0): accumulate per-feature sum / sum-of-squares of y1 = x @ W1
                      over every batch tile; finalize BN scale/shift on the last tile.
    phase 1 (p == 1): recompute y1 per tile, apply folded BN + LeakyReLU + fc2,
                      store a lane-dense [TB, 128] output tile.
    """
    p = pl.program_id(0)
    i = pl.program_id(1)
    nb = pl.num_programs(1)

    # fc: Linear(1024 -> 512), bf16 operands, f32 accumulation.  The fc bias is
    # intentionally omitted (cancels exactly inside training-mode BatchNorm).
    y1 = jnp.dot(x_ref[...], w1_ref[...],
                 preferred_element_type=jnp.float32)          # [TB, 512] f32

    @pl.when(p == 0)
    def _phase0():
        @pl.when(i == 0)
        def _init():
            sum_ref[...] = jnp.zeros_like(sum_ref)
            sumsq_ref[...] = jnp.zeros_like(sumsq_ref)

        # One-pass sum / sum-of-squares on the MXU (idle between the two big dots).
        ones = jnp.ones((1, y1.shape[0]), jnp.float32)
        sum_ref[...] += jnp.dot(ones, y1, preferred_element_type=jnp.float32)
        sumsq_ref[...] += jnp.dot(ones, y1 * y1,
                                  preferred_element_type=jnp.float32)

        @pl.when(i == nb - 1)
        def _finalize():
            mean = sum_ref[...] * inv_n
            # E[y^2] - mean^2: slightly less numerically stable than the two-pass
            # form, but fine at these magnitudes (and clamped at 0).
            var = jnp.maximum(sumsq_ref[...] * inv_n - mean * mean, 0.0)
            scale = gamma_ref[...] * lax.rsqrt(var + BN_EPS)   # rsqrt -> EUP slot
            scale_ref[...] = scale
            shift_ref[...] = beta_ref[...] - mean * scale

    @pl.when(p == 1)
    def _phase1():
        # Folded BN affine + LeakyReLU, all in f32.
        h = y1 * scale_ref[...] + shift_ref[...]
        h = jnp.where(h >= 0, h, LEAKY_SLOPE * h)
        # fc2: Linear(512 -> nz), padded to 128 lanes for an unmasked store.
        o_ref[...] = (jnp.dot(h.astype(w2_ref.dtype), w2_ref[...],
                              preferred_element_type=jnp.float32)
                      + b2_ref[...])


def e_forward(x, params):
    """Matches E.forward: x.view(-1, 1024) -> fc -> bn -> leaky_relu -> fc2."""
    w1_t, b1, gamma, beta, w2_t, b2 = params
    del b1  # mathematically a no-op under training-mode BatchNorm (see kernel note)

    xf = x.reshape(-1, D_IN)                      # the .view(-1, 1024)
    B = xf.shape[0]
    nz = w2_t.shape[1]

    # Batch tiling: pad B up to a multiple of the tile.  Zero rows contribute
    # exactly 0 to the BN sums (no fc bias), and the stats divisor is the true B.
    tb = min(TB_CAP, _round_up(B, 8))
    bp = _round_up(B, tb)
    nb = bp // tb

    # Lane-dense fc2 output: pad nz up to a multiple of 128, slice at the end.
    nzp = _round_up(nz, LANE)

    # bf16 matmul operands (accumulation stays f32 inside the kernel).
    xf = jnp.pad(xf.astype(jnp.float32), ((0, bp - B), (0, 0))).astype(jnp.bfloat16)
    w1_bf = w1_t.astype(jnp.bfloat16)
    w2_p = jnp.pad(w2_t.astype(jnp.bfloat16), ((0, 0), (0, nzp - nz)))
    b2_p = jnp.pad(b2.astype(jnp.float32), ((0, 0), (0, nzp - nz)))
    gamma = gamma.astype(jnp.float32)
    beta = beta.astype(jnp.float32)

    kernel = functools.partial(_e_kernel, inv_n=1.0 / B)

    out = pl.pallas_call(
        kernel,
        out_shape=jax.ShapeDtypeStruct((bp, nzp), jnp.float32),
        grid=(2, nb),
        in_specs=[
            pl.BlockSpec((tb, D_IN), lambda p, i: (i, 0)),     # x batch tile
            pl.BlockSpec((D_IN, D_HID), lambda p, i: (0, 0)),  # W1^T (resident)
            pl.BlockSpec((1, D_HID), lambda p, i: (0, 0)),     # BN gamma
            pl.BlockSpec((1, D_HID), lambda p, i: (0, 0)),     # BN beta
            pl.BlockSpec((D_HID, nzp), lambda p, i: (0, 0)),   # W2^T, lane-padded
            pl.BlockSpec((1, nzp), lambda p, i: (0, 0)),       # b2, lane-padded
        ],
        # Phase 0 pins the output spec to block 0 and never writes it; every block
        # is fully written during phase 1, so the final HBM contents are correct
        # under any writeback policy (and phase 0 adds no output HBM traffic).
        out_specs=pl.BlockSpec((tb, nzp), lambda p, i: (p * i, 0)),
        scratch_shapes=[
            pltpu.VMEM((1, D_HID), jnp.float32),   # per-feature sum
            pltpu.VMEM((1, D_HID), jnp.float32),   # per-feature sum of squares
            pltpu.VMEM((1, D_HID), jnp.float32),   # folded BN scale
            pltpu.VMEM((1, D_HID), jnp.float32),   # folded BN shift
        ],
        compiler_params=pltpu.CompilerParams(
            # BN batch stats couple all tiles through per-core scratch, so neither
            # axis may be "parallel" (megacore sharding would split the statistics).
            dimension_semantics=("arbitrary", "arbitrary")),
    )(xf, w1_bf, gamma, beta, w2_p, b2_p)

    return out[:B, :nz]


def e_reference(x, params):
    """Pure-JAX reference with matched matmul precision (bf16 operands, f32 acc)."""
    w1_t, b1, gamma, beta, w2_t, b2 = params
    xf = x.reshape(-1, D_IN).astype(jnp.float32)
    y1 = jnp.dot(xf.astype(jnp.bfloat16), w1_t.astype(jnp.bfloat16),
                 preferred_element_type=jnp.float32) + b1
    mean = jnp.mean(y1, axis=0, keepdims=True)
    var = jnp.mean((y1 - mean) ** 2, axis=0, keepdims=True)
    h = (y1 - mean) * lax.rsqrt(var + BN_EPS) * gamma + beta
    h = jnp.where(h >= 0, h, LEAKY_SLOPE * h)
    return jnp.dot(h.astype(jnp.bfloat16), w2_t.astype(jnp.bfloat16),
                   preferred_element_type=jnp.float32) + b2


def init_params(key, nz=NZ):
    """Deterministic init mimicking PyTorch nn.Linear defaults (U(-1/sqrt(fan_in), +))."""
    k1, k2, k3, k4 = jax.random.split(key, 4)
    s1 = 1.0 / jnp.sqrt(jnp.float32(D_IN))
    s2 = 1.0 / jnp.sqrt(jnp.float32(D_HID))
    w1_t = jax.random.uniform(k1, (D_IN, D_HID), jnp.float32, -s1, s1)   # [in, out]
    b1 = jax.random.uniform(k2, (1, D_HID), jnp.float32, -s1, s1)        # cancels in BN
    gamma = jnp.ones((1, D_HID), jnp.float32)                            # BN weight
    beta = jnp.zeros((1, D_HID), jnp.float32)                            # BN bias
    w2_t = jax.random.uniform(k3, (D_HID, nz), jnp.float32, -s2, s2)     # [in, out]
    b2 = jax.random.uniform(k4, (1, nz), jnp.float32, -s2, s2)
    return (w1_t, b1, gamma, beta, w2_t, b2)


if __name__ == "__main__":
    key = jax.random.PRNGKey(0)
    kx, kp = jax.random.split(key)

    # Small deterministic input: B=2 images of 1x32x32 (flattens to 1024).
    x = jax.random.normal(kx, (2, 1, 32, 32), dtype=jnp.float32)
    params = init_params(kp, nz=NZ)

    out = e_forward(x, params)
    jax.block_until_ready(out)
    assert out.shape == (2, NZ) and out.dtype == jnp.float32

    ref = e_reference(x, params)
    assert jnp.allclose(out, ref, atol=1e-2, rtol=1e-2), \
        float(jnp.max(jnp.abs(out - ref)))
    print("KERNEL_OK")
</pallas_src>

<mosaic_0001>
module attributes {stable_mosaic.version = 11 : i64} {
  func.func @_e_kernel(%arg0: i32, %arg1: i32, %arg2: memref<8x1024xbf16, #tpu.memory_space<vmem>>, %arg3: memref<1024x512xbf16, #tpu.memory_space<vmem>>, %arg4: memref<1x512xf32, #tpu.memory_space<vmem>>, %arg5: memref<1x512xf32, #tpu.memory_space<vmem>>, %arg6: memref<512x128xbf16, #tpu.memory_space<vmem>>, %arg7: memref<1x128xf32, #tpu.memory_space<vmem>>, %arg8: memref<8x128xf32, #tpu.memory_space<vmem>>, %arg9: memref<1x512xf32, #tpu.memory_space<vmem>>, %arg10: memref<1x512xf32, #tpu.memory_space<vmem>>, %arg11: memref<1x512xf32, #tpu.memory_space<vmem>>, %arg12: memref<1x512xf32, #tpu.memory_space<vmem>>) attributes {dimension_semantics = [#tpu.dimension_semantics<arbitrary>, #tpu.dimension_semantics<arbitrary>], iteration_bounds = array<i64: 2, 1>, scalar_prefetch = 0 : i64, scratch_operands = 4 : i64, tpu.core_type = #tpu.core_type<tc>, window_params = [{transform_indices = @transform_0, window_bounds = array<i64: 8, 1024>}, {pipeline_mode = #tpu.pipeline_mode<synchronous>, transform_indices = @transform_1, window_bounds = array<i64: 1024, 512>}, {pipeline_mode = #tpu.pipeline_mode<synchronous>, transform_indices = @transform_2, window_bounds = array<i64: 1, 512>}, {pipeline_mode = #tpu.pipeline_mode<synchronous>, transform_indices = @transform_3, window_bounds = array<i64: 1, 512>}, {pipeline_mode = #tpu.pipeline_mode<synchronous>, transform_indices = @transform_4, window_bounds = array<i64: 512, 128>}, {pipeline_mode = #tpu.pipeline_mode<synchronous>, transform_indices = @transform_5, window_bounds = array<i64: 1, 128>}, {transform_indices = @transform_6, window_bounds = array<i64: 8, 128>}]} {
    %c0 = arith.constant 0 : index
    %c0_0 = arith.constant 0 : index
    %0 = vector.load %arg2[%c0, %c0_0] : memref<8x1024xbf16, #tpu.memory_space<vmem>>, vector<8x1024xbf16>
    %c0_1 = arith.constant 0 : index
    %c0_2 = arith.constant 0 : index
    %1 = vector.load %arg3[%c0_1, %c0_2] : memref<1024x512xbf16, #tpu.memory_space<vmem>>, vector<1024x512xbf16>
    %cst = arith.constant dense<0.000000e+00> : vector<8x512xf32>
    %2 = tpu.matmul %0, %1, %cst {dimension_numbers = #tpu.dot_dimension_numbers<[1], [0], [0], [1], [0, 0, 1, 1], [], []>} : vector<8x1024xbf16>, vector<1024x512xbf16>, vector<8x512xf32> -> vector<8x512xf32>
    %c0_i32 = arith.constant 0 : i32
    %3 = arith.cmpi eq, %arg0, %c0_i32 : i32
    %4 = arith.extui %3 : i1 to i32
    %c0_i32_3 = arith.constant 0 : i32
    %5 = arith.cmpi ne, %4, %c0_i32_3 : i32
    scf.if %5 {
      %c0_i32_5 = arith.constant 0 : i32
      %9 = arith.cmpi eq, %arg1, %c0_i32_5 : i32
      %10 = arith.extui %9 : i1 to i32
      %c0_i32_6 = arith.constant 0 : i32
      %11 = arith.cmpi ne, %10, %c0_i32_6 : i32
      scf.if %11 {
        %cst_20 = arith.constant 0.000000e+00 : f32
        %25 = vector.broadcast %cst_20 : f32 to vector<1x512xf32>
        %c0_21 = arith.constant 0 : index
        %c0_22 = arith.constant 0 : index
        %26 = vector.load %arg9[%c0_21, %c0_22] : memref<1x512xf32, #tpu.memory_space<vmem>>, vector<1x512xf32>
        tpu.vector_store %arg9[%c0_21, %c0_22], %25 {strides = array<i32>} : memref<1x512xf32, #tpu.memory_space<vmem>>, vector<1x512xf32>,
        %cst_23 = arith.constant 0.000000e+00 : f32
        %27 = vector.broadcast %cst_23 : f32 to vector<1x512xf32>
        %c0_24 = arith.constant 0 : index
        %c0_25 = arith.constant 0 : index
        %28 = vector.load %arg10[%c0_24, %c0_25] : memref<1x512xf32, #tpu.memory_space<vmem>>, vector<1x512xf32>
        tpu.vector_store %arg10[%c0_24, %c0_25], %27 {strides = array<i32>} : memref<1x512xf32, #tpu.memory_space<vmem>>, vector<1x512xf32>,
      } else {
      }
      %cst_7 = arith.constant 1.000000e+00 : f32
      %12 = vector.broadcast %cst_7 : f32 to vector<1x8xf32>
      %c0_8 = arith.constant 0 : index
      %c0_9 = arith.constant 0 : index
      %13 = vector.load %arg9[%c0_8, %c0_9] : memref<1x512xf32, #tpu.memory_space<vmem>>, vector<1x512xf32>
      %cst_10 = arith.constant dense<0.000000e+00> : vector<1x512xf32>
      %14 = tpu.matmul %12, %2, %cst_10 {dimension_numbers = #tpu.dot_dimension_numbers<[1], [0], [0], [1], [0, 0, 1, 1], [], []>} : vector<1x8xf32>, vector<8x512xf32>, vector<1x512xf32> -> vector<1x512xf32>
      %15 = arith.addf %13, %14 : vector<1x512xf32>
      %c0_11 = arith.constant 0 : index
      %c0_12 = arith.constant 0 : index
      %16 = vector.load %arg9[%c0_11, %c0_12] : memref<1x512xf32, #tpu.memory_space<vmem>>, vector<1x512xf32>
      tpu.vector_store %arg9[%c0_11, %c0_12], %15 {strides = array<i32>} : memref<1x512xf32, #tpu.memory_space<vmem>>, vector<1x512xf32>,
      %c0_13 = arith.constant 0 : index
      %c0_14 = arith.constant 0 : index
      %17 = vector.load %arg10[%c0_13, %c0_14] : memref<1x512xf32, #tpu.memory_space<vmem>>, vector<1x512xf32>
      %18 = arith.mulf %2, %2 : vector<8x512xf32>
      %cst_15 = arith.constant dense<0.000000e+00> : vector<1x512xf32>
      %19 = tpu.matmul %12, %18, %cst_15 {dimension_numbers = #tpu.dot_dimension_numbers<[1], [0], [0], [1], [0, 0, 1, 1], [], []>} : vector<1x8xf32>, vector<8x512xf32>, vector<1x512xf32> -> vector<1x512xf32>
      %20 = arith.addf %17, %19 : vector<1x512xf32>
      %c0_16 = arith.constant 0 : index
      %c0_17 = arith.constant 0 : index
      %21 = vector.load %arg10[%c0_16, %c0_17] : memref<1x512xf32, #tpu.memory_space<vmem>>, vector<1x512xf32>
      tpu.vector_store %arg10[%c0_16, %c0_17], %20 {strides = array<i32>} : memref<1x512xf32, #tpu.memory_space<vmem>>, vector<1x512xf32>,
      %c0_i32_18 = arith.constant 0 : i32
      %22 = arith.cmpi eq, %arg1, %c0_i32_18 : i32
      %23 = arith.extui %22 : i1 to i32
      %c0_i32_19 = arith.constant 0 : i32
      %24 = arith.cmpi ne, %23, %c0_i32_19 : i32
      scf.if %24 {
        %c0_20 = arith.constant 0 : index
        %c0_21 = arith.constant 0 : index
        %25 = vector.load %arg9[%c0_20, %c0_21] : memref<1x512xf32, #tpu.memory_space<vmem>>, vector<1x512xf32>
        %cst_22 = arith.constant 5.000000e-01 : f32
        %26 = vector.broadcast %cst_22 : f32 to vector<1x512xf32>
        %27 = arith.mulf %25, %26 : vector<1x512xf32>
        %c0_23 = arith.constant 0 : index
        %c0_24 = arith.constant 0 : index
        %28 = vector.load %arg10[%c0_23, %c0_24] : memref<1x512xf32, #tpu.memory_space<vmem>>, vector<1x512xf32>
        %cst_25 = arith.constant 5.000000e-01 : f32
        %29 = vector.broadcast %cst_25 : f32 to vector<1x512xf32>
        %30 = arith.mulf %28, %29 : vector<1x512xf32>
        %31 = arith.mulf %27, %27 : vector<1x512xf32>
        %32 = arith.subf %30, %31 : vector<1x512xf32>
        %cst_26 = arith.constant 0.000000e+00 : f32
        %33 = vector.broadcast %cst_26 : f32 to vector<1x512xf32>
        %34 = arith.maximumf %32, %33 : vector<1x512xf32>
        %c0_27 = arith.constant 0 : index
        %c0_28 = arith.constant 0 : index
        %35 = vector.load %arg4[%c0_27, %c0_28] : memref<1x512xf32, #tpu.memory_space<vmem>>, vector<1x512xf32>
        %cst_29 = arith.constant 9.99999974E-6 : f32
        %36 = vector.broadcast %cst_29 : f32 to vector<1x512xf32>
        %37 = arith.addf %34, %36 : vector<1x512xf32>
        %38 = math.rsqrt %37 : vector<1x512xf32>
        %39 = arith.mulf %35, %38 : vector<1x512xf32>
        %c0_30 = arith.constant 0 : index
        %c0_31 = arith.constant 0 : index
        %40 = vector.load %arg11[%c0_30, %c0_31] : memref<1x512xf32, #tpu.memory_space<vmem>>, vector<1x512xf32>
        tpu.vector_store %arg11[%c0_30, %c0_31], %39 {strides = array<i32>} : memref<1x512xf32, #tpu.memory_space<vmem>>, vector<1x512xf32>,
        %c0_32 = arith.constant 0 : index
        %c0_33 = arith.constant 0 : index
        %41 = vector.load %arg5[%c0_32, %c0_33] : memref<1x512xf32, #tpu.memory_space<vmem>>, vector<1x512xf32>
        %42 = arith.mulf %27, %39 : vector<1x512xf32>
        %43 = arith.subf %41, %42 : vector<1x512xf32>
        %c0_34 = arith.constant 0 : index
        %c0_35 = arith.constant 0 : index
        %44 = vector.load %arg12[%c0_34, %c0_35] : memref<1x512xf32, #tpu.memory_space<vmem>>, vector<1x512xf32>
        tpu.vector_store %arg12[%c0_34, %c0_35], %43 {strides = array<i32>} : memref<1x512xf32, #tpu.memory_space<vmem>>, vector<1x512xf32>,
      } else {
      }
    } else {
    }
    %c1_i32 = arith.constant 1 : i32
    %6 = arith.cmpi eq, %arg0, %c1_i32 : i32
    %7 = arith.extui %6 : i1 to i32
    %c0_i32_4 = arith.constant 0 : i32
    %8 = arith.cmpi ne, %7, %c0_i32_4 : i32
    scf.if %8 {
      %c0_5 = arith.constant 0 : index
      %c0_6 = arith.constant 0 : index
      %9 = vector.load %arg11[%c0_5, %c0_6] : memref<1x512xf32, #tpu.memory_space<vmem>>, vector<1x512xf32>
      %10 = vector.broadcast %9 : vector<1x512xf32> to vector<8x512xf32>
      %11 = arith.mulf %2, %10 : vector<8x512xf32>
      %c0_7 = arith.constant 0 : index
      %c0_8 = arith.constant 0 : index
      %12 = vector.load %arg12[%c0_7, %c0_8] : memref<1x512xf32, #tpu.memory_space<vmem>>, vector<1x512xf32>
      %13 = vector.broadcast %12 : vector<1x512xf32> to vector<8x512xf32>
      %14 = arith.addf %11, %13 : vector<8x512xf32>
      %cst_9 = arith.constant 0.000000e+00 : f32
      %15 = vector.broadcast %cst_9 : f32 to vector<8x512xf32>
      %16 = arith.cmpf oge, %14, %15 : vector<8x512xf32>
      %cst_10 = arith.constant 0.00999999977 : f32
      %17 = vector.broadcast %cst_10 : f32 to vector<8x512xf32>
      %18 = arith.mulf %17, %14 : vector<8x512xf32>
      %19 = arith.select %16, %14, %18 : vector<8x512xi1>, vector<8x512xf32>
      %20 = arith.truncf %19 : vector<8x512xf32> to vector<8x512xbf16>
      %c0_11 = arith.constant 0 : index
      %c0_12 = arith.constant 0 : index
      %21 = vector.load %arg6[%c0_11, %c0_12] : memref<512x128xbf16, #tpu.memory_space<vmem>>, vector<512x128xbf16>
      %cst_13 = arith.constant dense<0.000000e+00> : vector<8x128xf32>
      %22 = tpu.matmul %20, %21, %cst_13 {dimension_numbers = #tpu.dot_dimension_numbers<[1], [0], [0], [1], [0, 0, 1, 1], [], []>} : vector<8x512xbf16>, vector<512x128xbf16>, vector<8x128xf32> -> vector<8x128xf32>
      %c0_14 = arith.constant 0 : index
      %c0_15 = arith.constant 0 : index
      %23 = vector.load %arg7[%c0_14, %c0_15] : memref<1x128xf32, #tpu.memory_space<vmem>>, vector<1x128xf32>
      %24 = vector.broadcast %23 : vector<1x128xf32> to vector<8x128xf32>
      %25 = arith.addf %22, %24 : vector<8x128xf32>
      %c0_16 = arith.constant 0 : index
      %c0_17 = arith.constant 0 : index
      %26 = vector.load %arg8[%c0_16, %c0_17] : memref<8x128xf32, #tpu.memory_space<vmem>>, vector<8x128xf32>
      tpu.vector_store %arg8[%c0_16, %c0_17], %25 {strides = array<i32>} : memref<8x128xf32, #tpu.memory_space<vmem>>, vector<8x128xf32>,
    } else {
    }
    return
  }
  func.func @transform_0(%arg0: i32, %arg1: i32) -> (i32, i32) {
    %c0_i32 = arith.constant 0 : i32
    %c0_i32_0 = arith.constant 0 : i32
    return %arg1, %c0_i32 : i32, i32
  }
  func.func @transform_1(%arg0: i32, %arg1: i32) -> (i32, i32) {
    %c0_i32 = arith.constant 0 : i32
    %c0_i32_0 = arith.constant 0 : i32
    %c0_i32_1 = arith.constant 0 : i32
    return %c0_i32, %c0_i32_0 : i32, i32
  }
  func.func @transform_2(%arg0: i32, %arg1: i32) -> (i32, i32) {
    %c0_i32 = arith.constant 0 : i32
    %c0_i32_0 = arith.constant 0 : i32
    %c0_i32_1 = arith.constant 0 : i32
    return %c0_i32, %c0_i32_0 : i32, i32
  }
  func.func @transform_3(%arg0: i32, %arg1: i32) -> (i32, i32) {
    %c0_i32 = arith.constant 0 : i32
    %c0_i32_0 = arith.constant 0 : i32
    %c0_i32_1 = arith.constant 0 : i32
    return %c0_i32, %c0_i32_0 : i32, i32
  }
  func.func @transform_4(%arg0: i32, %arg1: i32) -> (i32, i32) {
    %c0_i32 = arith.constant 0 : i32
    %c0_i32_0 = arith.constant 0 : i32
    %c0_i32_1 = arith.constant 0 : i32
    return %c0_i32, %c0_i32_0 : i32, i32
  }
  func.func @transform_5(%arg0: i32, %arg1: i32) -> (i32, i32) {
    %c0_i32 = arith.constant 0 : i32
    %c0_i32_0 = arith.constant 0 : i32
    %c0_i32_1 = arith.constant 0 : i32
    return %c0_i32, %c0_i32_0 : i32, i32
  }
  func.func @transform_6(%arg0: i32, %arg1: i32) -> (i32, i32) {
    %0 = arith.muli %arg0, %arg1 : i32
    %c0_i32 = arith.constant 0 : i32
    %c0_i32_0 = arith.constant 0 : i32
    return %0, %c0_i32 : i32, i32
  }
}

</mosaic_0001>

<bundles_post_ra>
// kernel: tpu_custom_call.1
= control target key start
LH: loop header
LB: loop body
LE: loop exit
PB: predicated region body
PF: predicated region fallthrough
CT: control target
= control target key end

     0   :  { %11 = vsyncpa [#allocation7], 0  ;;  %s4406_s0 = inlined_call_operand.hbm [shape: bf16[8,1024], index: 0, kind: input, shape index: {}]   ;;  %s4407_s1 = inlined_call_operand.hbm [shape: bf16[1024,512], index: 1, kind: input, shape index: {}]   ;;  %s4408_s2 = inlined_call_operand.vmem [shape: f32[1,512], index: 2, kind: input, shape index: {}]   ;;  %s4409_s3 = inlined_call_operand.vmem [shape: f32[1,512], index: 3, kind: input, shape index: {}]   ;;  %s4410_s4 = inlined_call_operand.hbm [shape: bf16[512,128], index: 4, kind: input, shape index: {}]   ;;  %s4411_s5 = inlined_call_operand.vmem [shape: f32[1,128], index: 5, kind: input, shape index: {}]   ;;  %s4412_s6 = inlined_call_operand.hbm [shape: f32[8,128], index: 6, kind: output, shape index: {}]  }
   0x1   :  { %12 = vsyncpa [#allocation10], 0 }
   0x2   :  { %13 = vsyncpa [#allocation8], 0 }
   0x3   :  { %15 = vsyncpa [#allocation8 + $0x1], 0  ;;  %s4181_s21 = smov 0   ;;  %s4183_s22 = smov 0  }
   0x4   :  { %s4185_s23 = smov 0  }
   0x5 LB: > { %s4135_s24 = smov [#allocation9]   ;;  %s3104_s26 = sadd.s32 4294967295, %s4133_s23   ;;  %s4133_s23 = sphi %s4185_s23, %s21_s23   ;;  %s4129_s22 = sphi %s4183_s22, %s4429_s22   ;;  %s4125_s21 = sphi %s4181_s21, %s4428_s21  }
   0x6   : > { %s223_s25 = sshll.u32 %s4135_s24, 4  ;;  %p3106_p0 = scmp.ge.s32.totalorder %s4133_s23, 1  ;;  %s224_s25 = int_to_ptr.vmem [resolvable:$true] %s223_s25 }
   0x7   : > { %p197_p1 = scmp.lt.s32.totalorder %s4133_s23, 3  ;;  %p4202_p2 = scmp.eq.s32.totalorder %s3104_s26, 0 }
   0x8   : > { %s33_s7 = sadd.s32 1, %s4129_s22  ;;  %s3989_s11 = scalar_lea.hbm %s4407_s1, 32768 }
   0x9   : > { %s4416_s28 = scalar_select %p4202_p2, 1, 0 }
   0xa   : > { %p4206_p3 = pnand %p3106_p0, %p197_p1  ;;  %p4219_p6 = scmp.ge.s32.totalorder %s33_s7, 2 }
   0xb   : > { %p3990_p7 = scmp.ne.s32.totalorder %s4407_s1, %s3989_s11  ;;  %p3996_p11 = scmp.lt.u32.totalorder %s3989_s11, %s4407_s1 }
   0xc   : > { %s4417_s29 = scalar_select %p4206_p3, 1, 0 }
   0xd   : > { %p3505_p4 = pneg %p4206_p3 }
   0xe   : > { %s4419_s8 = scalar_select %p4219_p6, 1, 0 }
   0xf   : > { %p4214_p5 = pnand %p4202_p2, %p3505_p4 }
  0x11   : > { %p4231_p8 = pneg %p4214_p5 }
  0x13   : > { %p3992_p9 = pnand %p4231_p8, %p3990_p7 }
  0x15   : > { %p3993_p10 = pneg %p3992_p9 }
  0x17   : > { %p3998_p12 = pnand %p3996_p11, %p3993_p10 }
  0x19   : > { %4001 = shalt.err (!%p3998_p12)
}
  0x1a   : > { %s4002_s17 = scalar_lea.vmem %s224_s25, 32768  ;;  %p4010_p4 = scmp.lt.s32.totalorder %s224_s25, %s224_s25 }
  0x1b   : > { %p4003_p13 = scmp.ne.s32.totalorder %s224_s25, %s4002_s17  ;;  %p4011_p2 = scmp.lt.s32.totalorder %s4002_s17, %s4002_s17 }
  0x1d   : > { %p4005_p0 = pnand %p4003_p13, %p4231_p8  ;;  %p4012_p3 = por %p4011_p2, %p4010_p4 }
  0x1f   : > { %p4006_p1 = pneg %p4005_p0 }
  0x21   : > { %p4013_p6 = pnand %p4012_p3, %p4006_p1 }
  0x23   : > { %4016 = shalt.err (!%p4013_p6)
}
  0x24   : > { %s4136_s18 = smov 256   ;;  %s4137_s19 = smov 16  }
  0x25   : > { %3511 = dma.hbm_to_vmem [thread:$0]  (!%p4214_p5), %s4407_s1, 32768, %s224_s25, [#allocation10], %s4136_s18, %s4136_s18, %s4137_s19  }
  0x26   : > { %p4421_p7 = scmp.ne.s32.totalorder %s4419_s8, 0  ;;  %s4138_s9 = smov [#allocation6]  }
  0x27   : > { %s213_s10 = sshll.u32 %s4138_s9, 4  ;;  %s4139_s11 = smov [#allocation11]   ;;  %s214_s10 = int_to_ptr.vmem [resolvable:$true] %s213_s10 }
  0x28   : > { %s4431_s7 = smov (%p4421_p7, %s33_s7), 0  ;;  %s242_s12 = sshll.u32 %s4139_s11, 4  ;;  %s243_s12 = int_to_ptr.vmem [resolvable:$true] %s242_s12 }
  0x29   : > { %s4017_s16 = scalar_lea.hbm %s4406_s0, 512 }
  0x2a   : > { %p4018_p2 = scmp.ne.s32.totalorder %s4406_s0, %s4017_s16  ;;  %p4024_p9 = scmp.lt.u32.totalorder %s4017_s16, %s4406_s0 }
  0x2c   : > { %p4020_p3 = pnand %p4018_p2, %p4231_p8 }
  0x2e   : > { %p4021_p6 = pneg %p4020_p3 }
  0x30   : > { %p4026_p10 = pnand %p4024_p9, %p4021_p6 }
  0x32   : > { %4029 = shalt.err (!%p4026_p10)
}
  0x33   : > { %s4030_s18 = scalar_lea.vmem %s214_s10, 512  ;;  %p4038_p0 = scmp.lt.s32.totalorder %s214_s10, %s214_s10 }
  0x34   : > { %p4031_p11 = scmp.ne.s32.totalorder %s214_s10, %s4030_s18  ;;  %p4039_p1 = scmp.lt.s32.totalorder %s4030_s18, %s4030_s18 }
  0x36   : > { %p4033_p12 = pnand %p4031_p11, %p4231_p8  ;;  %p4040_p4 = por %p4039_p1, %p4038_p0 }
  0x38   : > { %p4034_p13 = pneg %p4033_p12 }
  0x3a   : > { %p4041_p7 = pnand %p4040_p4, %p4034_p13 }
  0x3c   : > { %4044 = shalt.err (!%p4041_p7)
}
  0x3d   : > { %3508 = dma.hbm_to_vmem [thread:$0]  (!%p4214_p5), %s4406_s0, 512, %s214_s10, [#allocation7]  }
  0x3e   : > { %s4045_s9 = scalar_lea.hbm %s4410_s4, 4096 }
  0x3f   : > { %p4046_p2 = scmp.ne.s32.totalorder %s4410_s4, %s4045_s9  ;;  %p4052_p9 = scmp.lt.u32.totalorder %s4045_s9, %s4410_s4 }
  0x41   : > { %p4048_p3 = pnand %p4046_p2, %p4231_p8 }
  0x43   : > { %p4049_p6 = pneg %p4048_p3 }
  0x45   : > { %p4054_p10 = pnand %p4052_p9, %p4049_p6 }
  0x47   : > { %4057 = shalt.err (!%p4054_p10)
}
  0x48   : > { %s4058_s17 = scalar_lea.vmem %s243_s12, 4096  ;;  %p4066_p0 = scmp.lt.s32.totalorder %s243_s12, %s243_s12 }
  0x49   : > { %p4059_p11 = scmp.ne.s32.totalorder %s243_s12, %s4058_s17  ;;  %p4067_p1 = scmp.lt.s32.totalorder %s4058_s17, %s4058_s17 }
  0x4b   : > { %p4061_p12 = pnand %p4059_p11, %p4231_p8  ;;  %p4068_p4 = por %p4067_p1, %p4066_p0 }
  0x4d   : > { %p4062_p13 = pneg %p4061_p12 }
  0x4f   : > { %p4069_p7 = pnand %p4068_p4, %p4062_p13 }
  0x51   : > { %4072 = shalt.err (!%p4069_p7)
}
  0x52   : > { %s4140_s10 = smov 64   ;;  %s4141_s25 = smov 4  }
  0x53   : > { %3514 = dma.hbm_to_vmem [thread:$0]  (!%p4214_p5), %s4410_s4, 4096, %s243_s12, [#allocation10], %s4140_s10, %s4140_s10, %s4141_s25  }
  0x54   : > { %p4422_p2 = scmp.ne.s32.totalorder %s4417_s29, 0 }
  0x55   : > { %p4423_p3 = scmp.ne.s32.totalorder (!%p4422_p2), %s4416_s28, 0 }
  0x56   : > { %261 = sbr.rel (%p4422_p2) target bundleno = 1107 (0x453), region = 44 }
  0x5d   : > { %4112 = dma.done.wait (%p4423_p3), [#allocation7], 512  }
  0x5e   : > { %4114 = vsyncadd (%p4423_p3), [#allocation7], 4294966784 }
  0x5f   : > { %4116 = dma.done.wait (%p4423_p3), [#allocation10], 36864  }
  0x60   : > { %4118 = vsyncadd (%p4423_p3), [#allocation10], 4294930432  ;;  %v3563_v0 = vld [vmem:[#allocation9 + $0x4] ss:$16 sps:$4 sm:$0xff]   ;;  %v3565_v1 = vld [vmem:[#allocation9 + $0xc] ss:$16 sps:$4 sm:$0xff]  }
  0x61   : > { %1864 = vmatprep.subr.bf16.mxu0 %v3563_v0  ;;  %v3567_v2 = vld [vmem:[#allocation9] ss:$16 sps:$4 sm:$0xff]   ;;  %v3568_v3 = vld [vmem:[#allocation9 + $0x8] ss:$16 sps:$4 sm:$0xff]   ;;  %2028 = vmatprep.subr.bf16.mxu1 %v3565_v1  ;;  %v3569_v4 = vld [vmem:[#allocation9 + $0x24] ss:$16 sps:$4 sm:$0xff]  }
  0x62   : > { %1865 = vmatpush1.bf16.msra.mxu0 %v3567_v2  ;;  %2029 = vmatpush1.bf16.msra.mxu1 %v3568_v3  ;;  %v3571_v5 = vld [vmem:[#allocation9 + $0x2c] ss:$16 sps:$4 sm:$0xff]   ;;  %v3573_v6 = vld [vmem:[#allocation9 + $0x20] ss:$16 sps:$4 sm:$0xff]   ;;  %v3574_v7 = vld [vmem:[#allocation9 + $0x28] ss:$16 sps:$4 sm:$0xff]  }
  0x63   : > { %1866 = vmatprep.subr.bf16.mxu0 %v3569_v4  ;;  %2030 = vmatprep.subr.bf16.mxu1 %v3571_v5  ;;  %v3575_v8 = vld [vmem:[#allocation9 + $0x44] ss:$16 sps:$4 sm:$0xff]   ;;  %v3577_v9 = vld [vmem:[#allocation9 + $0x4c] ss:$16 sps:$4 sm:$0xff]   ;;  %v3579_v10 = vld [vmem:[#allocation9 + $0x40] ss:$16 sps:$4 sm:$0xff]  }
  0x64   : > { %v3580_v11 = vld [vmem:[#allocation9 + $0x48] ss:$16 sps:$4 sm:$0xff]   ;;  %v3581_v12 = vld [vmem:[#allocation9 + $0x64] ss:$16 sps:$4 sm:$0xff]   ;;  %v3583_v13 = vld [vmem:[#allocation9 + $0x6c] ss:$16 sps:$4 sm:$0xff]  }
  0x65   : > { %v3585_v14 = vld [vmem:[#allocation9 + $0x60] ss:$16 sps:$4 sm:$0xff]   ;;  %v3586_v15 = vld [vmem:[#allocation9 + $0x68] ss:$16 sps:$4 sm:$0xff]   ;;  %v3587_v16 = vld [vmem:[#allocation9 + $0x84] ss:$16 sps:$4 sm:$0xff]  }
  0x66   : > { %1867 = vmatpush1.bf16.msra.mxu0 %v3573_v6  ;;  %2031 = vmatpush1.bf16.msra.mxu1 %v3574_v7  ;;  %v3589_v17 = vld [vmem:[#allocation9 + $0x8c] ss:$16 sps:$4 sm:$0xff]   ;;  %v3591_v18 = vld [vmem:[#allocation9 + $0x80] ss:$16 sps:$4 sm:$0xff]   ;;  %v3592_v19 = vld [vmem:[#allocation9 + $0x88] ss:$16 sps:$4 sm:$0xff]  }
  0x67   : > { %1868 = vmatprep.subr.bf16.mxu0 %v3575_v8  ;;  %2032 = vmatprep.subr.bf16.mxu1 %v3577_v9  ;;  %v3593_v20 = vld [vmem:[#allocation9 + $0xa4] ss:$16 sps:$4 sm:$0xff]   ;;  %v3595_v21 = vld [vmem:[#allocation9 + $0xac] ss:$16 sps:$4 sm:$0xff]   ;;  %v3597_v22 = vld [vmem:[#allocation9 + $0xa0] ss:$16 sps:$4 sm:$0xff]  }
  0x68   : > { %v3598_v23 = vld [vmem:[#allocation9 + $0xa8] ss:$16 sps:$4 sm:$0xff]   ;;  %v3599_v24 = vld [vmem:[#allocation9 + $0xc4] ss:$16 sps:$4 sm:$0xff]   ;;  %v3601_v25 = vld [vmem:[#allocation9 + $0xcc] ss:$16 sps:$4 sm:$0xff]  }
  0x69   : > { %v3603_v26 = vld [vmem:[#allocation9 + $0xc0] ss:$16 sps:$4 sm:$0xff]   ;;  %v3604_v27 = vld [vmem:[#allocation9 + $0xc8] ss:$16 sps:$4 sm:$0xff]   ;;  %v3605_v28 = vld [vmem:[#allocation9 + $0xe4] ss:$16 sps:$4 sm:$0xff]  }
  0x6a   : > { %1869 = vmatpush1.bf16.msra.mxu0 %v3579_v10  ;;  %2033 = vmatpush1.bf16.msra.mxu1 %v3580_v11  ;;  %v3607_v29 = vld [vmem:[#allocation9 + $0xec] ss:$16 sps:$4 sm:$0xff]   ;;  %v3609_v30 = vld [vmem:[#allocation9 + $0xe0] ss:$16 sps:$4 sm:$0xff]   ;;  %v3610_v31 = vld [vmem:[#allocation9 + $0xe8] ss:$16 sps:$4 sm:$0xff]  }
  0x6b   : > { %1870 = vmatprep.subr.bf16.mxu0 %v3581_v12  ;;  %2034 = vmatprep.subr.bf16.mxu1 %v3583_v13  ;;  %v3611_v32 = vld [vmem:[#allocation9 + $0x104] ss:$16 sps:$4 sm:$0xff]   ;;  %v3613_v33 = vld [vmem:[#allocation9 + $0x10c] ss:$16 sps:$4 sm:$0xff]   ;;  %v3615_v34 = vld [vmem:[#allocation9 + $0x100] ss:$16 sps:$4 sm:$0xff]  }
  0x6c   : > { %v3616_v35 = vld [vmem:[#allocation9 + $0x108] ss:$16 sps:$4 sm:$0xff]   ;;  %v3617_v36 = vld [vmem:[#allocation9 + $0x124] ss:$16 sps:$4 sm:$0xff]   ;;  %v3619_v37 = vld [vmem:[#allocation9 + $0x12c] ss:$16 sps:$4 sm:$0xff]  }
  0x6d   : > { %v3621_v38 = vld [vmem:[#allocation9 + $0x120] ss:$16 sps:$4 sm:$0xff]   ;;  %v3622_v39 = vld [vmem:[#allocation9 + $0x128] ss:$16 sps:$4 sm:$0xff]   ;;  %v3623_v40 = vld [vmem:[#allocation9 + $0x144] ss:$16 sps:$4 sm:$0xff]  }
  0x6e   : > { %1871 = vmatpush1.bf16.msra.mxu0 %v3585_v14  ;;  %2035 = vmatpush1.bf16.msra.mxu1 %v3586_v15  ;;  %v3625_v41 = vld [vmem:[#allocation9 + $0x14c] ss:$16 sps:$4 sm:$0xff]   ;;  %v3627_v42 = vld [vmem:[#allocation9 + $0x140] ss:$16 sps:$4 sm:$0xff]   ;;  %v3628_v43 = vld [vmem:[#allocation9 + $0x148] ss:$16 sps:$4 sm:$0xff]  }
  0x6f   : > { %1872 = vmatprep.subr.bf16.mxu0 %v3587_v16  ;;  %2036 = vmatprep.subr.bf16.mxu1 %v3589_v17  ;;  %v3629_v44 = vld [vmem:[#allocation9 + $0x164] ss:$16 sps:$4 sm:$0xff]   ;;  %v3631_v45 = vld [vmem:[#allocation9 + $0x16c] ss:$16 sps:$4 sm:$0xff]   ;;  %v3633_v47 = vld [vmem:[#allocation9 + $0x160] ss:$16 sps:$4 sm:$0xff]  }
  0x70   : > { %v296_v46 = vld [vmem:[#allocation6] sm:$0xff]  ;;  %v3634_v49 = vld [vmem:[#allocation9 + $0x168] ss:$16 sps:$4 sm:$0xff]   ;;  %v3637_v51 = vld [vmem:[#allocation9 + $0x18c] ss:$16 sps:$4 sm:$0xff]   ;;  %p3378_p5 = scmp.ne.s32.totalorder %s4125_s21, 0 }
  0x71   : > { %v3115_v48 = vcombine.high %v296_v46, %v296_v46  ;;  %v3635_v50 = vld [vmem:[#allocation9 + $0x184] ss:$16 sps:$4 sm:$0xff]   ;;  %v3639_v52 = vld [vmem:[#allocation9 + $0x180] ss:$16 sps:$4 sm:$0xff]   ;;  %v3640_v53 = vld [vmem:[#allocation9 + $0x188] ss:$16 sps:$4 sm:$0xff]   ;;  %v3114_v4 = vcombine.low %v296_v46, %v296_v46 }
  0x72   : > { %1873 = vmatpush1.bf16.msra.mxu0 %v3591_v18  ;;  %2037 = vmatpush1.bf16.msra.mxu1 %v3592_v19  ;;  %v3641_v54 = vld [vmem:[#allocation9 + $0x1a4] ss:$16 sps:$4 sm:$0xff]   ;;  %v3643_v55 = vld [vmem:[#allocation9 + $0x1ac] ss:$16 sps:$4 sm:$0xff]   ;;  %v3645_v56 = vld [vmem:[#allocation9 + $0x1a0] ss:$16 sps:$4 sm:$0xff]  }
  0x73   : > { %1874 = vmatprep.subr.bf16.mxu0 %v3593_v20  ;;  %2038 = vmatprep.subr.bf16.mxu1 %v3595_v21  ;;  %v3646_v57 = vld [vmem:[#allocation9 + $0x1a8] ss:$16 sps:$4 sm:$0xff]   ;;  %v3647_v58 = vld [vmem:[#allocation9 + $0x1c4] ss:$16 sps:$4 sm:$0xff]   ;;  %v3649_v59 = vld [vmem:[#allocation9 + $0x1cc] ss:$16 sps:$4 sm:$0xff]  }
  0x74   : > { %1896 = vmatprep.mubr.bf16.mxu0 %v3115_v48  ;;  %2060 = vmatprep.mubr.bf16.mxu1 %v3115_v48  ;;  %v3651_v60 = vld [vmem:[#allocation9 + $0x1c0] ss:$16 sps:$4 sm:$0xff]   ;;  %v3652_v61 = vld [vmem:[#allocation9 + $0x1c8] ss:$16 sps:$4 sm:$0xff]   ;;  %v3653_v62 = vld [vmem:[#allocation9 + $0x1e4] ss:$16 sps:$4 sm:$0xff]  }
  0x75   : > { %v3655_v63 = vld [vmem:[#allocation9 + $0x1ec] ss:$16 sps:$4 sm:$0xff]   ;;  %v3657_v0 = vld [vmem:[#allocation9 + $0x1e0] ss:$16 sps:$4 sm:$0xff]   ;;  %v3658_v1 = vld [vmem:[#allocation9 + $0x1e8] ss:$16 sps:$4 sm:$0xff]  }
  0x76   : > { %1875 = vmatpush1.bf16.msra.mxu0 %v3597_v22  ;;  %2039 = vmatpush1.bf16.msra.mxu1 %v3598_v23  ;;  %v3663_v2 = vld [vmem:[#allocation9 + $0x204] ss:$16 sps:$4 sm:$0xff]   ;;  %v3666_v3 = vld [vmem:[#allocation9 + $0x20c] ss:$16 sps:$4 sm:$0xff]   ;;  %v3661_v5 = vld [vmem:[#allocation9 + $0x200] ss:$16 sps:$4 sm:$0xff]  }
  0x77   : > { %1876 = vmatprep.subr.bf16.mxu0 %v3599_v24  ;;  %2040 = vmatprep.subr.bf16.mxu1 %v3601_v25  ;;  %v3664_v6 = vld [vmem:[#allocation9 + $0x208] ss:$16 sps:$4 sm:$0xff]   ;;  %v3669_v7 = vld [vmem:[#allocation9 + $0x224] ss:$16 sps:$4 sm:$0xff]   ;;  %v3672_v8 = vld [vmem:[#allocation9 + $0x22c] ss:$16 sps:$4 sm:$0xff]  }
  0x78   : > { %v3667_v9 = vld [vmem:[#allocation9 + $0x220] ss:$16 sps:$4 sm:$0xff]   ;;  %v3670_v10 = vld [vmem:[#allocation9 + $0x228] ss:$16 sps:$4 sm:$0xff]   ;;  %v3675_v11 = vld [vmem:[#allocation9 + $0x244] ss:$16 sps:$4 sm:$0xff]  }
  0x79   : > { %v3678_v12 = vld [vmem:[#allocation9 + $0x24c] ss:$16 sps:$4 sm:$0xff]   ;;  %v3673_v13 = vld [vmem:[#allocation9 + $0x240] ss:$16 sps:$4 sm:$0xff]   ;;  %v3676_v14 = vld [vmem:[#allocation9 + $0x248] ss:$16 sps:$4 sm:$0xff]  }
  0x7a   : > { %1877 = vmatpush1.bf16.msra.mxu0 %v3603_v26  ;;  %2041 = vmatpush1.bf16.msra.mxu1 %v3604_v27  ;;  %v3681_v15 = vld [vmem:[#allocation9 + $0x264] ss:$16 sps:$4 sm:$0xff]   ;;  %v3684_v16 = vld [vmem:[#allocation9 + $0x26c] ss:$16 sps:$4 sm:$0xff]   ;;  %v3679_v17 = vld [vmem:[#allocation9 + $0x260] ss:$16 sps:$4 sm:$0xff]  }
  0x7b   : > { %1878 = vmatprep.subr.bf16.mxu0 %v3605_v28  ;;  %2042 = vmatprep.subr.bf16.mxu1 %v3607_v29  ;;  %v3682_v18 = vld [vmem:[#allocation9 + $0x268] ss:$16 sps:$4 sm:$0xff]   ;;  %v3687_v19 = vld [vmem:[#allocation9 + $0x284] ss:$16 sps:$4 sm:$0xff]   ;;  %v3690_v20 = vld [vmem:[#allocation9 + $0x28c] ss:$16 sps:$4 sm:$0xff]  }
  0x7c   : > { %v3685_v21 = vld [vmem:[#allocation9 + $0x280] ss:$16 sps:$4 sm:$0xff]   ;;  %v3688_v22 = vld [vmem:[#allocation9 + $0x288] ss:$16 sps:$4 sm:$0xff]   ;;  %v3693_v23 = vld [vmem:[#allocation9 + $0x2a4] ss:$16 sps:$4 sm:$0xff]  }
  0x7d   : > { %v3696_v24 = vld [vmem:[#allocation9 + $0x2ac] ss:$16 sps:$4 sm:$0xff]   ;;  %v3691_v25 = vld [vmem:[#allocation9 + $0x2a0] ss:$16 sps:$4 sm:$0xff]   ;;  %v3694_v26 = vld [vmem:[#allocation9 + $0x2a8] ss:$16 sps:$4 sm:$0xff]  }
  0x7e   : > { %1879 = vmatpush1.bf16.msra.mxu0 %v3609_v30  ;;  %2043 = vmatpush1.bf16.msra.mxu1 %v3610_v31  ;;  %v3699_v27 = vld [vmem:[#allocation9 + $0x2c4] ss:$16 sps:$4 sm:$0xff]   ;;  %v3702_v28 = vld [vmem:[#allocation9 + $0x2cc] ss:$16 sps:$4 sm:$0xff]   ;;  %v3697_v31 = vld [vmem:[#allocation9 + $0x2c0] ss:$16 sps:$4 sm:$0xff]  }
  0x7f   : > { %1880 = vmatprep.subr.bf16.mxu0 %v3611_v32  ;;  %2044 = vmatprep.subr.bf16.mxu1 %v3613_v33  ;;  %v4297_v29 = vld [vmem:[#allocation6 + $0x8] sm:$0xff]  ;;  %v3705_v33 = vld [vmem:[#allocation9 + $0x2e4] ss:$16 sps:$4 sm:$0xff]   ;;  %vm2207_vm0 = vcmask (!%p3378_p5), 64512  }
  0x80   : > { %v3117_v30 = vcombine.high %v4297_v29, %v4297_v29  ;;  %v3700_v32 = vld [vmem:[#allocation9 + $0x2c8] ss:$16 sps:$4 sm:$0xff]   ;;  %v3726_v46 = vld [vmem:[#allocation9 + $0x34c] ss:$16 sps:$4 sm:$0xff]  }
  0x81   : > { %v3724_v48 = vld [vmem:[#allocation9 + $0x348] ss:$16 sps:$4 sm:$0xff]  }
  0x82   : > { %1881 = vmatpush1.bf16.msra.mxu0 %v3615_v34  ;;  %2045 = vmatpush1.bf16.msra.mxu1 %v3616_v35  ;;  %v3708_v34 = vld [vmem:[#allocation9 + $0x2ec] ss:$16 sps:$4 sm:$0xff]   ;;  %v3703_v35 = vld [vmem:[#allocation9 + $0x2e0] ss:$16 sps:$4 sm:$0xff]  }
  0x83   : > { %1882 = vmatprep.subr.bf16.mxu0 %v3617_v36  ;;  %2046 = vmatprep.subr.bf16.mxu1 %v3619_v37  ;;  %v3706_v36 = vld [vmem:[#allocation9 + $0x2e8] ss:$16 sps:$4 sm:$0xff]   ;;  %v3711_v37 = vld [vmem:[#allocation9 + $0x304] ss:$16 sps:$4 sm:$0xff]  }
  0x86   : > { %1883 = vmatpush1.bf16.msra.mxu0 %v3621_v38  ;;  %2047 = vmatpush1.bf16.msra.mxu1 %v3622_v39  ;;  %v3714_v38 = vld [vmem:[#allocation9 + $0x30c] ss:$16 sps:$4 sm:$0xff]   ;;  %v3709_v39 = vld [vmem:[#allocation9 + $0x300] ss:$16 sps:$4 sm:$0xff]  }
  0x87   : > { %1884 = vmatprep.subr.bf16.mxu0 %v3623_v40  ;;  %2048 = vmatprep.subr.bf16.mxu1 %v3625_v41  ;;  %v3712_v40 = vld [vmem:[#allocation9 + $0x308] ss:$16 sps:$4 sm:$0xff]   ;;  %v3717_v41 = vld [vmem:[#allocation9 + $0x324] ss:$16 sps:$4 sm:$0xff]  }
  0x8a   : > { %1885 = vmatpush1.bf16.msra.mxu0 %v3627_v42  ;;  %2049 = vmatpush1.bf16.msra.mxu1 %v3628_v43  ;;  %v3720_v42 = vld [vmem:[#allocation9 + $0x32c] ss:$16 sps:$4 sm:$0xff]   ;;  %v3715_v43 = vld [vmem:[#allocation9 + $0x320] ss:$16 sps:$4 sm:$0xff]  }
  0x8b   : > { %1886 = vmatprep.subr.bf16.mxu0 %v3629_v44  ;;  %2050 = vmatprep.subr.bf16.mxu1 %v3631_v45  ;;  %v3718_v44 = vld [vmem:[#allocation9 + $0x328] ss:$16 sps:$4 sm:$0xff]   ;;  %v3723_v45 = vld [vmem:[#allocation9 + $0x344] ss:$16 sps:$4 sm:$0xff]  }
  0x8e   : > { %1887 = vmatpush1.bf16.msra.mxu0 %v3633_v47  ;;  %2051 = vmatpush1.bf16.msra.mxu1 %v3634_v49  ;;  %v3721_v47 = vld [vmem:[#allocation9 + $0x340] ss:$16 sps:$4 sm:$0xff]   ;;  %v3729_v49 = vld [vmem:[#allocation9 + $0x364] ss:$16 sps:$4 sm:$0xff]  }
  0x8f   : > { %1888 = vmatprep.subr.bf16.mxu0 %v3635_v50  ;;  %2052 = vmatprep.subr.bf16.mxu1 %v3637_v51  ;;  %v3732_v50 = vld [vmem:[#allocation9 + $0x36c] ss:$16 sps:$4 sm:$0xff]   ;;  %v3727_v51 = vld [vmem:[#allocation9 + $0x360] ss:$16 sps:$4 sm:$0xff]  }
  0x92   : > { %1889 = vmatpush1.bf16.msra.mxu0 %v3639_v52  ;;  %2053 = vmatpush1.bf16.msra.mxu1 %v3640_v53  ;;  %v3730_v52 = vld [vmem:[#allocation9 + $0x368] ss:$16 sps:$4 sm:$0xff]   ;;  %v3735_v53 = vld [vmem:[#allocation9 + $0x384] ss:$16 sps:$4 sm:$0xff]  }
  0x93   : > { %1890 = vmatprep.subr.bf16.mxu0 %v3641_v54  ;;  %2054 = vmatprep.subr.bf16.mxu1 %v3643_v55  ;;  %v3738_v54 = vld [vmem:[#allocation9 + $0x38c] ss:$16 sps:$4 sm:$0xff]   ;;  %v3733_v55 = vld [vmem:[#allocation9 + $0x380] ss:$16 sps:$4 sm:$0xff]  }
  0x96   : > { %1891 = vmatpush1.bf16.msra.mxu0 %v3645_v56  ;;  %2055 = vmatpush1.bf16.msra.mxu1 %v3646_v57  ;;  %v3736_v56 = vld [vmem:[#allocation9 + $0x388] ss:$16 sps:$4 sm:$0xff]   ;;  %v3741_v57 = vld [vmem:[#allocation9 + $0x3a4] ss:$16 sps:$4 sm:$0xff]  }
  0x97   : > { %1892 = vmatprep.subr.bf16.mxu0 %v3647_v58  ;;  %2056 = vmatprep.subr.bf16.mxu1 %v3649_v59  ;;  %v3744_v58 = vld [vmem:[#allocation9 + $0x3ac] ss:$16 sps:$4 sm:$0xff]   ;;  %v3739_v59 = vld [vmem:[#allocation9 + $0x3a0] ss:$16 sps:$4 sm:$0xff]  }
  0x9a   : > { %1893 = vmatpush1.bf16.msra.mxu0 %v3651_v60  ;;  %2057 = vmatpush1.bf16.msra.mxu1 %v3652_v61  ;;  %v3742_v60 = vld [vmem:[#allocation9 + $0x3a8] ss:$16 sps:$4 sm:$0xff]   ;;  %v3747_v61 = vld [vmem:[#allocation9 + $0x3c4] ss:$16 sps:$4 sm:$0xff]  }
  0x9b   : > { %1894 = vmatprep.subr.bf16.mxu0 %v3653_v62  ;;  %2058 = vmatprep.subr.bf16.mxu1 %v3655_v63  ;;  %v3750_v62 = vld [vmem:[#allocation9 + $0x3cc] ss:$16 sps:$4 sm:$0xff]   ;;  %v3745_v63 = vld [vmem:[#allocation9 + $0x3c0] ss:$16 sps:$4 sm:$0xff]  }
  0x9e   : > { %1895 = vmatpush1.bf16.msra.mxu0 %v3657_v0  ;;  %2059 = vmatpush1.bf16.msra.mxu1 %v3658_v1  ;;  %v3748_v0 = vld [vmem:[#allocation9 + $0x3c8] ss:$16 sps:$4 sm:$0xff]   ;;  %v3753_v1 = vld [vmem:[#allocation9 + $0x3e4] ss:$16 sps:$4 sm:$0xff]  }
  0x9f   : > { %1905 = vmatprep.subr.bf16.mxu0 %v3663_v2  ;;  %2069 = vmatprep.subr.bf16.mxu1 %v3666_v3  ;;  %v3756_v2 = vld [vmem:[#allocation9 + $0x3ec] ss:$16 sps:$4 sm:$0xff]   ;;  %v3751_v3 = vld [vmem:[#allocation9 + $0x3e0] ss:$16 sps:$4 sm:$0xff]  }
  0xa1   : > { %1897 = vmatmul.mubr.bf16.vlgmr.msra.gmra.mrb[0].mxu0 %v3114_v4  ;;  %2061 = vmatmul.mubr.bf16.vlgmr.msra.gmra.mrb[0].mxu1 %v3114_v4  ;;  %v3754_v4 = vld [vmem:[#allocation9 + $0x3e8] ss:$16 sps:$4 sm:$0xff]  }
  0xa2   : > { %1906 = vmatpush1.bf16.msra.mxu0 %v3661_v5  ;;  %2070 = vmatpush1.bf16.msra.mxu1 %v3664_v6  ;;  %v3761_v5 = vld [vmem:[#allocation9 + $0x404] ss:$16 sps:$4 sm:$0xff]   ;;  %v3764_v6 = vld [vmem:[#allocation9 + $0x40c] ss:$16 sps:$4 sm:$0xff]  }
  0xa3   : > { %1907 = vmatprep.subr.bf16.mxu0 %v3669_v7  ;;  %2071 = vmatprep.subr.bf16.mxu1 %v3672_v8  ;;  %v3116_v7 = vcombine.low %v4297_v29, %v4297_v29  ;;  %v3759_v8 = vld [vmem:[#allocation9 + $0x400] ss:$16 sps:$4 sm:$0xff]   ;;  %v3794_v29 = vld [vmem:[#allocation9 + $0x4ac] ss:$16 sps:$4 sm:$0xff]  }
  0xa4   : > { %1937 = vmatprep.mubr.bf16.mxu0 %v3117_v30  ;;  %2101 = vmatprep.mubr.bf16.mxu1 %v3117_v30  ;;  %v3789_v30 = vld [vmem:[#allocation9 + $0x4a0] ss:$16 sps:$4 sm:$0xff]  }
  0xa6   : > { %1908 = vmatpush1.bf16.msra.mxu0 %v3667_v9  ;;  %2072 = vmatpush1.bf16.msra.mxu1 %v3670_v10  ;;  %v3762_v9 = vld [vmem:[#allocation9 + $0x408] ss:$16 sps:$4 sm:$0xff]   ;;  %v3767_v10 = vld [vmem:[#allocation9 + $0x424] ss:$16 sps:$4 sm:$0xff]  }
  0xa7   : > { %1909 = vmatprep.subr.bf16.mxu0 %v3675_v11  ;;  %2073 = vmatprep.subr.bf16.mxu1 %v3678_v12  ;;  %v4303_v11 = vld [vmem:[#allocation6 + $0x10] sm:$0xff]  ;;  %v3770_v12 = vld [vmem:[#allocation9 + $0x42c] ss:$16 sps:$4 sm:$0xff]  }
  0xaa   : > { %1910 = vmatpush1.bf16.msra.mxu0 %v3673_v13  ;;  %2074 = vmatpush1.bf16.msra.mxu1 %v3676_v14  ;;  %v3119_v13 = vcombine.high %v4303_v11, %v4303_v11  ;;  %v3765_v14 = vld [vmem:[#allocation9 + $0x420] ss:$16 sps:$4 sm:$0xff]  }
  0xab   : > { %1911 = vmatprep.subr.bf16.mxu0 %v3681_v15  ;;  %2075 = vmatprep.subr.bf16.mxu1 %v3684_v16  ;;  %v3768_v15 = vld [vmem:[#allocation9 + $0x428] ss:$16 sps:$4 sm:$0xff]   ;;  %v3773_v16 = vld [vmem:[#allocation9 + $0x444] ss:$16 sps:$4 sm:$0xff]  }
  0xae   : > { %1912 = vmatpush1.bf16.msra.mxu0 %v3679_v17  ;;  %2076 = vmatpush1.bf16.msra.mxu1 %v3682_v18  ;;  %v3776_v17 = vld [vmem:[#allocation9 + $0x44c] ss:$16 sps:$4 sm:$0xff]   ;;  %v3771_v18 = vld [vmem:[#allocation9 + $0x440] ss:$16 sps:$4 sm:$0xff]  }
  0xaf   : > { %1913 = vmatprep.subr.bf16.mxu0 %v3687_v19  ;;  %2077 = vmatprep.subr.bf16.mxu1 %v3690_v20  ;;  %v3774_v19 = vld [vmem:[#allocation9 + $0x448] ss:$16 sps:$4 sm:$0xff]   ;;  %v3779_v20 = vld [vmem:[#allocation9 + $0x464] ss:$16 sps:$4 sm:$0xff]  }
  0xb2   : > { %1914 = vmatpush1.bf16.msra.mxu0 %v3685_v21  ;;  %2078 = vmatpush1.bf16.msra.mxu1 %v3688_v22  ;;  %v3782_v21 = vld [vmem:[#allocation9 + $0x46c] ss:$16 sps:$4 sm:$0xff]   ;;  %v3777_v22 = vld [vmem:[#allocation9 + $0x460] ss:$16 sps:$4 sm:$0xff]  }
  0xb3   : > { %1915 = vmatprep.subr.bf16.mxu0 %v3693_v23  ;;  %2079 = vmatprep.subr.bf16.mxu1 %v3696_v24  ;;  %v3780_v23 = vld [vmem:[#allocation9 + $0x468] ss:$16 sps:$4 sm:$0xff]   ;;  %v3785_v24 = vld [vmem:[#allocation9 + $0x484] ss:$16 sps:$4 sm:$0xff]  }
  0xb6   : > { %1916 = vmatpush1.bf16.msra.mxu0 %v3691_v25  ;;  %2080 = vmatpush1.bf16.msra.mxu1 %v3694_v26  ;;  %v3788_v25 = vld [vmem:[#allocation9 + $0x48c] ss:$16 sps:$4 sm:$0xff]   ;;  %v3783_v26 = vld [vmem:[#allocation9 + $0x480] ss:$16 sps:$4 sm:$0xff]  }
  0xb7   : > { %1917 = vmatprep.subr.bf16.mxu0 %v3699_v27  ;;  %2081 = vmatprep.subr.bf16.mxu1 %v3702_v28  ;;  %v3786_v27 = vld [vmem:[#allocation9 + $0x488] ss:$16 sps:$4 sm:$0xff]   ;;  %v3791_v28 = vld [vmem:[#allocation9 + $0x4a4] ss:$16 sps:$4 sm:$0xff]  }
  0xba   : > { %1918 = vmatpush1.bf16.msra.mxu0 %v3697_v31  ;;  %2082 = vmatpush1.bf16.msra.mxu1 %v3700_v32  ;;  %v3792_v31 = vld [vmem:[#allocation9 + $0x4a8] ss:$16 sps:$4 sm:$0xff]   ;;  %v3797_v32 = vld [vmem:[#allocation9 + $0x4c4] ss:$16 sps:$4 sm:$0xff]  }
  0xbb   : > { %1919 = vmatprep.subr.bf16.mxu0 %v3705_v33  ;;  %2083 = vmatprep.subr.bf16.mxu1 %v3708_v34  ;;  %v3800_v33 = vld [vmem:[#allocation9 + $0x4cc] ss:$16 sps:$4 sm:$0xff]   ;;  %v3795_v34 = vld [vmem:[#allocation9 + $0x4c0] ss:$16 sps:$4 sm:$0xff]  }
  0xbe   : > { %1920 = vmatpush1.bf16.msra.mxu0 %v3703_v35  ;;  %2084 = vmatpush1.bf16.msra.mxu1 %v3706_v36  ;;  %v3798_v35 = vld [vmem:[#allocation9 + $0x4c8] ss:$16 sps:$4 sm:$0xff]   ;;  %v3803_v36 = vld [vmem:[#allocation9 + $0x4e4] ss:$16 sps:$4 sm:$0xff]  }
  0xbf   : > { %1921 = vmatprep.subr.bf16.mxu0 %v3711_v37  ;;  %2085 = vmatprep.subr.bf16.mxu1 %v3714_v38  ;;  %v3806_v37 = vld [vmem:[#allocation9 + $0x4ec] ss:$16 sps:$4 sm:$0xff]   ;;  %v3801_v38 = vld [vmem:[#allocation9 + $0x4e0] ss:$16 sps:$4 sm:$0xff]  }
  0xc2   : > { %1922 = vmatpush1.bf16.msra.mxu0 %v3709_v39  ;;  %2086 = vmatpush1.bf16.msra.mxu1 %v3712_v40  ;;  %v3804_v39 = vld [vmem:[#allocation9 + $0x4e8] ss:$16 sps:$4 sm:$0xff]   ;;  %v3809_v40 = vld [vmem:[#allocation9 + $0x504] ss:$16 sps:$4 sm:$0xff]  }
  0xc3   : > { %1923 = vmatprep.subr.bf16.mxu0 %v3717_v41  ;;  %2087 = vmatprep.subr.bf16.mxu1 %v3720_v42  ;;  %v3812_v41 = vld [vmem:[#allocation9 + $0x50c] ss:$16 sps:$4 sm:$0xff]   ;;  %v3807_v42 = vld [vmem:[#allocation9 + $0x500] ss:$16 sps:$4 sm:$0xff]  }
  0xc6   : > { %1924 = vmatpush1.bf16.msra.mxu0 %v3715_v43  ;;  %2088 = vmatpush1.bf16.msra.mxu1 %v3718_v44  ;;  %v3810_v43 = vld [vmem:[#allocation9 + $0x508] ss:$16 sps:$4 sm:$0xff]   ;;  %v3815_v44 = vld [vmem:[#allocation9 + $0x524] ss:$16 sps:$4 sm:$0xff]  }
  0xc7   : > { %1925 = vmatprep.subr.bf16.mxu0 %v3723_v45  ;;  %2089 = vmatprep.subr.bf16.mxu1 %v3726_v46  ;;  %v3818_v45 = vld [vmem:[#allocation9 + $0x52c] ss:$16 sps:$4 sm:$0xff]   ;;  %v3813_v46 = vld [vmem:[#allocation9 + $0x520] ss:$16 sps:$4 sm:$0xff]  }
  0xca   : > { %1926 = vmatpush1.bf16.msra.mxu0 %v3721_v47  ;;  %2090 = vmatpush1.bf16.msra.mxu1 %v3724_v48  ;;  %v3816_v47 = vld [vmem:[#allocation9 + $0x528] ss:$16 sps:$4 sm:$0xff]   ;;  %v3821_v48 = vld [vmem:[#allocation9 + $0x544] ss:$16 sps:$4 sm:$0xff]  }
  0xcb   : > { %1927 = vmatprep.subr.bf16.mxu0 %v3729_v49  ;;  %2091 = vmatprep.subr.bf16.mxu1 %v3732_v50  ;;  %v3824_v49 = vld [vmem:[#allocation9 + $0x54c] ss:$16 sps:$4 sm:$0xff]   ;;  %v3819_v50 = vld [vmem:[#allocation9 + $0x540] ss:$16 sps:$4 sm:$0xff]  }
  0xce   : > { %1928 = vmatpush1.bf16.msra.mxu0 %v3727_v51  ;;  %2092 = vmatpush1.bf16.msra.mxu1 %v3730_v52  ;;  %v3822_v51 = vld [vmem:[#allocation9 + $0x548] ss:$16 sps:$4 sm:$0xff]   ;;  %v3827_v52 = vld [vmem:[#allocation9 + $0x564] ss:$16 sps:$4 sm:$0xff]  }
  0xcf   : > { %1929 = vmatprep.subr.bf16.mxu0 %v3735_v53  ;;  %2093 = vmatprep.subr.bf16.mxu1 %v3738_v54  ;;  %v3830_v53 = vld [vmem:[#allocation9 + $0x56c] ss:$16 sps:$4 sm:$0xff]   ;;  %v3825_v54 = vld [vmem:[#allocation9 + $0x560] ss:$16 sps:$4 sm:$0xff]  }
  0xd2   : > { %1930 = vmatpush1.bf16.msra.mxu0 %v3733_v55  ;;  %2094 = vmatpush1.bf16.msra.mxu1 %v3736_v56  ;;  %v3828_v55 = vld [vmem:[#allocation9 + $0x568] ss:$16 sps:$4 sm:$0xff]   ;;  %v3833_v56 = vld [vmem:[#allocation9 + $0x584] ss:$16 sps:$4 sm:$0xff]  }
  0xd3   : > { %1931 = vmatprep.subr.bf16.mxu0 %v3741_v57  ;;  %2095 = vmatprep.subr.bf16.mxu1 %v3744_v58  ;;  %v3836_v57 = vld [vmem:[#allocation9 + $0x58c] ss:$16 sps:$4 sm:$0xff]   ;;  %v3831_v58 = vld [vmem:[#allocation9 + $0x580] ss:$16 sps:$4 sm:$0xff]  }
  0xd6   : > { %1932 = vmatpush1.bf16.msra.mxu0 %v3739_v59  ;;  %2096 = vmatpush1.bf16.msra.mxu1 %v3742_v60  ;;  %v3834_v59 = vld [vmem:[#allocation9 + $0x588] ss:$16 sps:$4 sm:$0xff]   ;;  %v3839_v60 = vld [vmem:[#allocation9 + $0x5a4] ss:$16 sps:$4 sm:$0xff]  }
  0xd7   : > { %1933 = vmatprep.subr.bf16.mxu0 %v3747_v61  ;;  %2097 = vmatprep.subr.bf16.mxu1 %v3750_v62  ;;  %v3842_v61 = vld [vmem:[#allocation9 + $0x5ac] ss:$16 sps:$4 sm:$0xff]   ;;  %v3837_v62 = vld [vmem:[#allocation9 + $0x5a0] ss:$16 sps:$4 sm:$0xff]  }
  0xda   : > { %1934 = vmatpush1.bf16.msra.mxu0 %v3745_v63  ;;  %2098 = vmatpush1.bf16.msra.mxu1 %v3748_v0  ;;  %v3840_v63 = vld [vmem:[#allocation9 + $0x5a8] ss:$16 sps:$4 sm:$0xff]   ;;  %v3845_v0 = vld [vmem:[#allocation9 + $0x5c4] ss:$16 sps:$4 sm:$0xff]  }
  0xdb   : > { %1935 = vmatprep.subr.bf16.mxu0 %v3753_v1  ;;  %2099 = vmatprep.subr.bf16.mxu1 %v3756_v2  ;;  %v3848_v1 = vld [vmem:[#allocation9 + $0x5cc] ss:$16 sps:$4 sm:$0xff]   ;;  %v3843_v2 = vld [vmem:[#allocation9 + $0x5c0] ss:$16 sps:$4 sm:$0xff]  }
  0xde   : > { %1936 = vmatpush1.bf16.msra.mxu0 %v3751_v3  ;;  %2100 = vmatpush1.bf16.msra.mxu1 %v3754_v4  ;;  %v3846_v3 = vld [vmem:[#allocation9 + $0x5c8] ss:$16 sps:$4 sm:$0xff]   ;;  %v3851_v4 = vld [vmem:[#allocation9 + $0x5e4] ss:$16 sps:$4 sm:$0xff]  }
  0xdf   : > { %1946 = vmatprep.subr.bf16.mxu0 %v3761_v5  ;;  %2110 = vmatprep.subr.bf16.mxu1 %v3764_v6  ;;  %v3854_v5 = vld [vmem:[#allocation9 + $0x5ec] ss:$16 sps:$4 sm:$0xff]   ;;  %v3849_v6 = vld [vmem:[#allocation9 + $0x5e0] ss:$16 sps:$4 sm:$0xff]  }
  0xe1   : > { %1938 = vmatmul.mubr.bf16.vlgmr.msra.gmra.mrb[0].mxu0 %v3116_v7  ;;  %2102 = vmatmul.mubr.bf16.vlgmr.msra.gmra.mrb[0].mxu1 %v3116_v7  ;;  %v3852_v7 = vld [vmem:[#allocation9 + $0x5e8] ss:$16 sps:$4 sm:$0xff]  }
  0xe2   : > { %1947 = vmatpush1.bf16.msra.mxu0 %v3759_v8  ;;  %2111 = vmatpush1.bf16.msra.mxu1 %v3762_v9  ;;  %v3859_v8 = vld [vmem:[#allocation9 + $0x604] ss:$16 sps:$4 sm:$0xff]   ;;  %v3862_v9 = vld [vmem:[#allocation9 + $0x60c] ss:$16 sps:$4 sm:$0xff]  }
  0xe3   : > { %1948 = vmatprep.subr.bf16.mxu0 %v3767_v10  ;;  %2112 = vmatprep.subr.bf16.mxu1 %v3770_v12  ;;  %v3118_v10 = vcombine.low %v4303_v11, %v4303_v11  ;;  %v4309_v12 = vld [vmem:[#allocation6 + $0x18] sm:$0xff]  ;;  %v3871_v11 = vld [vmem:[#allocation9 + $0x644] ss:$16 sps:$4 sm:$0xff]  }
  0xe4   : > { %1978 = vmatprep.mubr.bf16.mxu0 %v3119_v13  ;;  %2142 = vmatprep.mubr.bf16.mxu1 %v3119_v13  ;;  %v3857_v13 = vld [vmem:[#allocation9 + $0x600] ss:$16 sps:$4 sm:$0xff]  }
  0xe6   : > { %1949 = vmatpush1.bf16.msra.mxu0 %v3765_v14  ;;  %2113 = vmatpush1.bf16.msra.mxu1 %v3768_v15  ;;  %v3860_v14 = vld [vmem:[#allocation9 + $0x608] ss:$16 sps:$4 sm:$0xff]   ;;  %v3865_v15 = vld [vmem:[#allocation9 + $0x624] ss:$16 sps:$4 sm:$0xff]  }
  0xe7   : > { %1950 = vmatprep.subr.bf16.mxu0 %v3773_v16  ;;  %2114 = vmatprep.subr.bf16.mxu1 %v3776_v17  ;;  %v3868_v16 = vld [vmem:[#allocation9 + $0x62c] ss:$16 sps:$4 sm:$0xff]   ;;  %v3121_v17 = vcombine.high %v4309_v12, %v4309_v12 }
  0xea   : > { %1951 = vmatpush1.bf16.msra.mxu0 %v3771_v18  ;;  %2115 = vmatpush1.bf16.msra.mxu1 %v3774_v19  ;;  %v3863_v18 = vld [vmem:[#allocation9 + $0x620] ss:$16 sps:$4 sm:$0xff]   ;;  %v3866_v19 = vld [vmem:[#allocation9 + $0x628] ss:$16 sps:$4 sm:$0xff]  }
  0xeb   : > { %1952 = vmatprep.subr.bf16.mxu0 %v3779_v20  ;;  %2116 = vmatprep.subr.bf16.mxu1 %v3782_v21  ;;  %v3874_v20 = vld [vmem:[#allocation9 + $0x64c] ss:$16 sps:$4 sm:$0xff]   ;;  %v3869_v21 = vld [vmem:[#allocation9 + $0x640] ss:$16 sps:$4 sm:$0xff]  }
  0xee   : > { %1953 = vmatpush1.bf16.msra.mxu0 %v3777_v22  ;;  %2117 = vmatpush1.bf16.msra.mxu1 %v3780_v23  ;;  %v3872_v22 = vld [vmem:[#allocation9 + $0x648] ss:$16 sps:$4 sm:$0xff]   ;;  %v3877_v23 = vld [vmem:[#allocation9 + $0x664] ss:$16 sps:$4 sm:$0xff]  }
  0xef   : > { %1954 = vmatprep.subr.bf16.mxu0 %v3785_v24  ;;  %2118 = vmatprep.subr.bf16.mxu1 %v3788_v25  ;;  %v3880_v24 = vld [vmem:[#allocation9 + $0x66c] ss:$16 sps:$4 sm:$0xff]   ;;  %v3875_v25 = vld [vmem:[#allocation9 + $0x660] ss:$16 sps:$4 sm:$0xff]  }
  0xf2   : > { %1955 = vmatpush1.bf16.msra.mxu0 %v3783_v26  ;;  %2119 = vmatpush1.bf16.msra.mxu1 %v3786_v27  ;;  %v3878_v26 = vld [vmem:[#allocation9 + $0x668] ss:$16 sps:$4 sm:$0xff]   ;;  %v3883_v27 = vld [vmem:[#allocation9 + $0x684] ss:$16 sps:$4 sm:$0xff]  }
  0xf3   : > { %1956 = vmatprep.subr.bf16.mxu0 %v3791_v28  ;;  %2120 = vmatprep.subr.bf16.mxu1 %v3794_v29  ;;  %v3886_v28 = vld [vmem:[#allocation9 + $0x68c] ss:$16 sps:$4 sm:$0xff]   ;;  %v3881_v29 = vld [vmem:[#allocation9 + $0x680] ss:$16 sps:$4 sm:$0xff]  }
  0xf6   : > { %1957 = vmatpush1.bf16.msra.mxu0 %v3789_v30  ;;  %2121 = vmatpush1.bf16.msra.mxu1 %v3792_v31  ;;  %v3884_v30 = vld [vmem:[#allocation9 + $0x688] ss:$16 sps:$4 sm:$0xff]   ;;  %v3889_v31 = vld [vmem:[#allocation9 + $0x6a4] ss:$16 sps:$4 sm:$0xff]  }
  0xf7   : > { %1958 = vmatprep.subr.bf16.mxu0 %v3797_v32  ;;  %2122 = vmatprep.subr.bf16.mxu1 %v3800_v33  ;;  %v3892_v32 = vld [vmem:[#allocation9 + $0x6ac] ss:$16 sps:$4 sm:$0xff]   ;;  %v3887_v33 = vld [vmem:[#allocation9 + $0x6a0] ss:$16 sps:$4 sm:$0xff]  }
  0xfa   : > { %1959 = vmatpush1.bf16.msra.mxu0 %v3795_v34  ;;  %2123 = vmatpush1.bf16.msra.mxu1 %v3798_v35  ;;  %v3890_v34 = vld [vmem:[#allocation9 + $0x6a8] ss:$16 sps:$4 sm:$0xff]   ;;  %v3895_v35 = vld [vmem:[#allocation9 + $0x6c4] ss:$16 sps:$4 sm:$0xff]  }
  0xfb   : > { %1960 = vmatprep.subr.bf16.mxu0 %v3803_v36  ;;  %2124 = vmatprep.subr.bf16.mxu1 %v3806_v37  ;;  %v3898_v36 = vld [vmem:[#allocation9 + $0x6cc] ss:$16 sps:$4 sm:$0xff]   ;;  %v3893_v37 = vld [vmem:[#allocation9 + $0x6c0] ss:$16 sps:$4 sm:$0xff]  }
  0xfe   : > { %1961 = vmatpush1.bf16.msra.mxu0 %v3801_v38  ;;  %2125 = vmatpush1.bf16.msra.mxu1 %v3804_v39  ;;  %v3896_v38 = vld [vmem:[#allocation9 + $0x6c8] ss:$16 sps:$4 sm:$0xff]   ;;  %v3901_v39 = vld [vmem:[#allocation9 + $0x6e4] ss:$16 sps:$4 sm:$0xff]  }
  0xff   : > { %1962 = vmatprep.subr.bf16.mxu0 %v3809_v40  ;;  %2126 = vmatprep.subr.bf16.mxu1 %v3812_v41  ;;  %v3904_v40 = vld [vmem:[#allocation9 + $0x6ec] ss:$16 sps:$4 sm:$0xff]   ;;  %v3899_v41 = vld [vmem:[#allocation9 + $0x6e0] ss:$16 sps:$4 sm:$0xff]  }
 0x102   : > { %1963 = vmatpush1.bf16.msra.mxu0 %v3807_v42  ;;  %2127 = vmatpush1.bf16.msra.mxu1 %v3810_v43  ;;  %v3902_v42 = vld [vmem:[#allocation9 + $0x6e8] ss:$16 sps:$4 sm:$0xff]   ;;  %v3907_v43 = vld [vmem:[#allocation9 + $0x704] ss:$16 sps:$4 sm:$0xff]  }
 0x103   : > { %1964 = vmatprep.subr.bf16.mxu0 %v3815_v44  ;;  %2128 = vmatprep.subr.bf16.mxu1 %v3818_v45  ;;  %v3910_v44 = vld [vmem:[#allocation9 + $0x70c] ss:$16 sps:$4 sm:$0xff]   ;;  %v3905_v45 = vld [vmem:[#allocation9 + $0x700] ss:$16 sps:$4 sm:$0xff]  }
 0x106   : > { %1965 = vmatpush1.bf16.msra.mxu0 %v3813_v46  ;;  %2129 = vmatpush1.bf16.msra.mxu1 %v3816_v47  ;;  %v3908_v46 = vld [vmem:[#allocation9 + $0x708] ss:$16 sps:$4 sm:$0xff]   ;;  %v3913_v47 = vld [vmem:[#allocation9 + $0x724] ss:$16 sps:$4 sm:$0xff]  }
 0x107   : > { %1966 = vmatprep.subr.bf16.mxu0 %v3821_v48  ;;  %2130 = vmatprep.subr.bf16.mxu1 %v3824_v49  ;;  %v3916_v48 = vld [vmem:[#allocation9 + $0x72c] ss:$16 sps:$4 sm:$0xff]   ;;  %v3911_v49 = vld [vmem:[#allocation9 + $0x720] ss:$16 sps:$4 sm:$0xff]  }
 0x10a   : > { %1967 = vmatpush1.bf16.msra.mxu0 %v3819_v50  ;;  %2131 = vmatpush1.bf16.msra.mxu1 %v3822_v51  ;;  %v3914_v50 = vld [vmem:[#allocation9 + $0x728] ss:$16 sps:$4 sm:$0xff]   ;;  %v3919_v51 = vld [vmem:[#allocation9 + $0x744] ss:$16 sps:$4 sm:$0xff]  }
 0x10b   : > { %1968 = vmatprep.subr.bf16.mxu0 %v3827_v52  ;;  %2132 = vmatprep.subr.bf16.mxu1 %v3830_v53  ;;  %v3922_v52 = vld [vmem:[#allocation9 + $0x74c] ss:$16 sps:$4 sm:$0xff]   ;;  %v3917_v53 = vld [vmem:[#allocation9 + $0x740] ss:$16 sps:$4 sm:$0xff]  }
 0x10e   : > { %1969 = vmatpush1.bf16.msra.mxu0 %v3825_v54  ;;  %2133 = vmatpush1.bf16.msra.mxu1 %v3828_v55  ;;  %v3920_v54 = vld [vmem:[#allocation9 + $0x748] ss:$16 sps:$4 sm:$0xff]   ;;  %v3925_v55 = vld [vmem:[#allocation9 + $0x764] ss:$16 sps:$4 sm:$0xff]  }
 0x10f   : > { %1970 = vmatprep.subr.bf16.mxu0 %v3833_v56  ;;  %2134 = vmatprep.subr.bf16.mxu1 %v3836_v57  ;;  %v3928_v56 = vld [vmem:[#allocation9 + $0x76c] ss:$16 sps:$4 sm:$0xff]   ;;  %v3923_v57 = vld [vmem:[#allocation9 + $0x760] ss:$16 sps:$4 sm:$0xff]  }
 0x112   : > { %1971 = vmatpush1.bf16.msra.mxu0 %v3831_v58  ;;  %2135 = vmatpush1.bf16.msra.mxu1 %v3834_v59  ;;  %v3926_v58 = vld [vmem:[#allocation9 + $0x768] ss:$16 sps:$4 sm:$0xff]   ;;  %v3931_v59 = vld [vmem:[#allocation9 + $0x784] ss:$16 sps:$4 sm:$0xff]  }
 0x113   : > { %1972 = vmatprep.subr.bf16.mxu0 %v3839_v60  ;;  %2136 = vmatprep.subr.bf16.mxu1 %v3842_v61  ;;  %v3934_v60 = vld [vmem:[#allocation9 + $0x78c] ss:$16 sps:$4 sm:$0xff]   ;;  %v3929_v61 = vld [vmem:[#allocation9 + $0x780] ss:$16 sps:$4 sm:$0xff]  }
 0x116   : > { %1973 = vmatpush1.bf16.msra.mxu0 %v3837_v62  ;;  %2137 = vmatpush1.bf16.msra.mxu1 %v3840_v63  ;;  %v3932_v62 = vld [vmem:[#allocation9 + $0x788] ss:$16 sps:$4 sm:$0xff]   ;;  %v3937_v63 = vld [vmem:[#allocation9 + $0x7a4] ss:$16 sps:$4 sm:$0xff]  }
 0x117   : > { %1974 = vmatprep.subr.bf16.mxu0 %v3845_v0  ;;  %2138 = vmatprep.subr.bf16.mxu1 %v3848_v1  ;;  %v3940_v0 = vld [vmem:[#allocation9 + $0x7ac] ss:$16 sps:$4 sm:$0xff]   ;;  %v3935_v1 = vld [vmem:[#allocation9 + $0x7a0] ss:$16 sps:$4 sm:$0xff]  }
 0x11a   : > { %1975 = vmatpush1.bf16.msra.mxu0 %v3843_v2  ;;  %2139 = vmatpush1.bf16.msra.mxu1 %v3846_v3  ;;  %v3938_v2 = vld [vmem:[#allocation9 + $0x7a8] ss:$16 sps:$4 sm:$0xff]   ;;  %v3943_v3 = vld [vmem:[#allocation9 + $0x7c4] ss:$16 sps:$4 sm:$0xff]  }
 0x11b   : > { %1976 = vmatprep.subr.bf16.mxu0 %v3851_v4  ;;  %2140 = vmatprep.subr.bf16.mxu1 %v3854_v5  ;;  %v3946_v4 = vld [vmem:[#allocation9 + $0x7cc] ss:$16 sps:$4 sm:$0xff]   ;;  %v3941_v5 = vld [vmem:[#allocation9 + $0x7c0] ss:$16 sps:$4 sm:$0xff]  }
 0x11e   : > { %1977 = vmatpush1.bf16.msra.mxu0 %v3849_v6  ;;  %2141 = vmatpush1.bf16.msra.mxu1 %v3852_v7  ;;  %v3944_v6 = vld [vmem:[#allocation9 + $0x7c8] ss:$16 sps:$4 sm:$0xff]   ;;  %v3949_v7 = vld [vmem:[#allocation9 + $0x7e4] ss:$16 sps:$4 sm:$0xff]  }
 0x11f   : > { %1987 = vmatprep.subr.bf16.mxu0 %v3859_v8  ;;  %2151 = vmatprep.subr.bf16.mxu1 %v3862_v9  ;;  %v3952_v8 = vld [vmem:[#allocation9 + $0x7ec] ss:$16 sps:$4 sm:$0xff]   ;;  %v3947_v9 = vld [vmem:[#allocation9 + $0x7e0] ss:$16 sps:$4 sm:$0xff]  }
 0x121   : > { %1979 = vmatmul.mubr.bf16.vlgmr.msra.gmra.mrb[0].mxu0 %v3118_v10  ;;  %2143 = vmatmul.mubr.bf16.vlgmr.msra.gmra.mrb[0].mxu1 %v3118_v10  ;;  %v3950_v10 = vld [vmem:[#allocation9 + $0x7e8] ss:$16 sps:$4 sm:$0xff]  }
 0x122   : > { %1988 = vmatpush1.bf16.msra.mxu0 %v3857_v13  ;;  %2152 = vmatpush1.bf16.msra.mxu1 %v3860_v14  ;;  %v3120_v13 = vcombine.low %v4309_v12, %v4309_v12 }
 0x123   : > { %1989 = vmatprep.subr.bf16.mxu0 %v3865_v15  ;;  %2153 = vmatprep.subr.bf16.mxu1 %v3868_v16 }
 0x124   : > { %2019 = vmatprep.mubr.bf16.mxu0 %v3121_v17  ;;  %2183 = vmatprep.mubr.bf16.mxu1 %v3121_v17 }
 0x126   : > { %1990 = vmatpush1.bf16.msra.mxu0 %v3863_v18  ;;  %2154 = vmatpush1.bf16.msra.mxu1 %v3866_v19 }
 0x127   : > { %1991 = vmatprep.subr.bf16.mxu0 %v3871_v11  ;;  %2155 = vmatprep.subr.bf16.mxu1 %v3874_v20 }
 0x12a   : > { %1992 = vmatpush1.bf16.msra.mxu0 %v3869_v21  ;;  %2156 = vmatpush1.bf16.msra.mxu1 %v3872_v22  ;;  %v4142_v21 = vmov (!%p3378_p5), 0.0  }
 0x12b   : > { %1993 = vmatprep.subr.bf16.mxu0 %v3877_v23  ;;  %2157 = vmatprep.subr.bf16.mxu1 %v3880_v24 }
 0x12e   : > { %1994 = vmatpush1.bf16.msra.mxu0 %v3875_v25  ;;  %2158 = vmatpush1.bf16.msra.mxu1 %v3878_v26  ;;  %v4143_v25 = vmov (!%p3378_p5), 1.0   ;;  %v2200_v26 = vlaneseq (!%p3378_p5) }
 0x12f   : > { %1995 = vmatprep.subr.bf16.mxu0 %v3883_v27  ;;  %2159 = vmatprep.subr.bf16.mxu1 %v3886_v28  ;;  %v4144_v28 = vmov (!%p3378_p5), 1966171168  }
 0x130   : > { %vm4340_vm1 = vcmp.lt.s32.totalorder (!%p3378_p5), %v2200_v26, 512 }
 0x131   : > { %2204 = vst.msk [vmem:[#allocation2] sm:$0xf] (!%p3378_p5), %vm4340_vm1, %v4142_v21  ;;  %2205 = vst.msk [vmem:[#allocation3] sm:$0xf] (!%p3378_p5), %vm4340_vm1, %v4142_v21 }
 0x132   : > { %1996 = vmatpush1.bf16.msra.mxu0 %v3881_v29  ;;  %2160 = vmatpush1.bf16.msra.mxu1 %v3884_v30  ;;  %v2360_v29 = vunpack.c.l.s4 (!%p3378_p5), %v4144_v28 }
 0x133   : > { %1997 = vmatprep.subr.bf16.mxu0 %v3889_v31  ;;  %2161 = vmatprep.subr.bf16.mxu1 %v3892_v32  ;;  %v2363_v31 = vshrl.u32 (!%p3378_p5), %v2200_v26, 7 }
 0x134   : > { %v2361_v30 = vunpack.c.0.s8 (!%p3378_p5), %v2360_v29 }
 0x136   : > { %1998 = vmatpush1.bf16.msra.mxu0 %v3887_v33  ;;  %2162 = vmatpush1.bf16.msra.mxu1 %v3890_v34  ;;  %v2364_v34 = vsub.s32 (!%p3378_p5), %v2361_v30, %v2363_v31 }
 0x137   : > { %1999 = vmatprep.subr.bf16.mxu0 %v3895_v35  ;;  %2163 = vmatprep.subr.bf16.mxu1 %v3898_v36 }
 0x13a   : > { %2000 = vmatpush1.bf16.msra.mxu0 %v3893_v37  ;;  %2164 = vmatpush1.bf16.msra.mxu1 %v3896_v38 }
 0x13b   : > { %2001 = vmatprep.subr.bf16.mxu0 %v3901_v39  ;;  %2165 = vmatprep.subr.bf16.mxu1 %v3904_v40 }
 0x13e   : > { %2002 = vmatpush1.bf16.msra.mxu0 %v3899_v41  ;;  %2166 = vmatpush1.bf16.msra.mxu1 %v3902_v42 }
 0x13f   : > { %2003 = vmatprep.subr.bf16.mxu0 %v3907_v43  ;;  %2167 = vmatprep.subr.bf16.mxu1 %v3910_v44 }
 0x142   : > { %2004 = vmatpush1.bf16.msra.mxu0 %v3905_v45  ;;  %2168 = vmatpush1.bf16.msra.mxu1 %v3908_v46 }
 0x143   : > { %2005 = vmatprep.subr.bf16.mxu0 %v3913_v47  ;;  %2169 = vmatprep.subr.bf16.mxu1 %v3916_v48  ;;  %v2206_v48 = vld [vmem:[#allocation2] sm:$0xf] (!%p3378_p5) }
 0x146   : > { %2006 = vmatpush1.bf16.msra.mxu0 %v3911_v49  ;;  %2170 = vmatpush1.bf16.msra.mxu1 %v3914_v50 }
 0x147   : > { %2007 = vmatprep.subr.bf16.mxu0 %v3919_v51  ;;  %2171 = vmatprep.subr.bf16.mxu1 %v3922_v52 }
 0x14a   : > { %2008 = vmatpush1.bf16.msra.mxu0 %v3917_v53  ;;  %2172 = vmatpush1.bf16.msra.mxu1 %v3920_v54  ;;  %v2388_v54 = vld [vmem:[#allocation3] sm:$0xf] (!%p3378_p5) }
 0x14b   : > { %2009 = vmatprep.subr.bf16.mxu0 %v3925_v55  ;;  %2173 = vmatprep.subr.bf16.mxu1 %v3928_v56 }
 0x14e   : > { %2010 = vmatpush1.bf16.msra.mxu0 %v3923_v57  ;;  %2174 = vmatpush1.bf16.msra.mxu1 %v3926_v58 }
 0x14f   : > { %2011 = vmatprep.subr.bf16.mxu0 %v3931_v59  ;;  %2175 = vmatprep.subr.bf16.mxu1 %v3934_v60 }
 0x152   : > { %2012 = vmatpush1.bf16.msra.mxu0 %v3929_v61  ;;  %2176 = vmatpush1.bf16.msra.mxu1 %v3932_v62 }
 0x153   : > { %2013 = vmatprep.subr.bf16.mxu0 %v3937_v63  ;;  %2177 = vmatprep.subr.bf16.mxu1 %v3940_v0 }
 0x156   : > { %2014 = vmatpush1.bf16.msra.mxu0 %v3935_v1  ;;  %2178 = vmatpush1.bf16.msra.mxu1 %v3938_v2  ;;  %v2576_v1 = vld [vmem:[%s4408_s2] sm:$0xf] (!%p3378_p5) }
 0x157   : > { %2015 = vmatprep.subr.bf16.mxu0 %v3943_v3  ;;  %2179 = vmatprep.subr.bf16.mxu1 %v3946_v4  ;;  %v2581_v4 = vld [vmem:[%s4409_s3] sm:$0xf] (!%p3378_p5) }
 0x15a   : > { %2016 = vmatpush1.bf16.msra.mxu0 %v3941_v5  ;;  %2180 = vmatpush1.bf16.msra.mxu1 %v3944_v6 }
 0x15b   : > { %2017 = vmatprep.subr.bf16.mxu0 %v3949_v7  ;;  %2181 = vmatprep.subr.bf16.mxu1 %v3952_v8 }
 0x15e   : > { %2018 = vmatpush1.bf16.msra.mxu0 %v3947_v9  ;;  %2182 = vmatpush1.bf16.msra.mxu1 %v3950_v10 }
 0x161   : > { %2020 = vmatmul.mubr.bf16.vlgmr.msra.gmra.mrb[0].mxu0 %v3120_v13  ;;  %2184 = vmatmul.mubr.bf16.vlgmr.msra.gmra.mrb[0].mxu1 %v3120_v13 }
 0x162   : > { %2275 = vmatprep.mubr.f32.mxu0 (!%p3378_p5), %v4142_v21  ;;  %2346 = vmatprep.mubr.f32.mxu1 (!%p3378_p5), %v4142_v21 }
 0x231   : > { %2195 = sbr.rel (%p3378_p5) target bundleno = 829 (0x33d), region = 60 }
 0x234   : > { %v4315_v14 = vpop.f32.mrb[0].mxu0  ;;  %v4317_v15 = vpop.f32.mrb[0].mxu1 }
 0x235   : > { %v4319_v16 = vpop.f32.mrb[1].mxu0  ;;  %v4321_v17 = vpop.f32.mrb[1].mxu1  ;;  %v2389_v23 = vmul.f32 (!%p3378_p5), %v4315_v14, %v4315_v14  ;;  %v2391_v24 = vmul.f32 (!%p3378_p5), %v4317_v15, %v4317_v15 }
 0x236   : > { %v2025_v18 = vpop.f32.mrb[2].mxu0  ;;  %v2189_v19 = vpop.f32.mrb[2].mxu1  ;;  %2211 = vmatprep.subr.mxu0 (!%p3378_p5), %v4319_v16  ;;  %2282 = vmatprep.subr.mxu1 (!%p3378_p5), %v4321_v17  ;;  %v2390_v12 = vmul.f32 (!%p3378_p5), %v4319_v16, %v4319_v16  ;;  %v2392_v22 = vmul.f32 (!%p3378_p5), %v4321_v17, %v4321_v17 }
 0x237   : > { %v2026_v11 = vpop.f32.mrb[3].mxu0  ;;  %v2190_v20 = vpop.f32.mrb[3].mxu1  ;;  %2212 = vmatpush1.msra.mxu0 (!%p3378_p5), %v4315_v14  ;;  %2283 = vmatpush1.msra.mxu1 (!%p3378_p5), %v4317_v15 }
 0x238   : > { %3379 = vmatmul.mubr.msk.f32.vlgmr.msra.gmra.mrb[0].mxu0 %vm2207_vm0, %v4143_v25  ;;  %3380 = vmatmul.mubr.msk.f32.vlgmr.msra.gmra.mrb[0].mxu1 %vm2207_vm0, %v4143_v25 }
 0x239   : > { %2393 = vmatprep.subr.mxu0 %v2390_v12  ;;  %2464 = vmatprep.subr.mxu1 %v2392_v22 }
 0x23a   : > { %2394 = vmatpush1.msra.mxu0 %v2389_v23  ;;  %2465 = vmatpush1.msra.mxu1 %v2391_v24 }
 0x23b   : > { %2457 = vmatprep.mubr.f32.mxu0 %v4142_v21  ;;  %2528 = vmatprep.mubr.f32.mxu1 %v4142_v21 }
 0x23c   : > { %3381 = vmatmul.mubr.msk.f32.vlgmr.msra.gmra.mrb[2].mxu0 %vm2207_vm0, %v4143_v25  ;;  %3382 = vmatmul.mubr.msk.f32.vlgmr.msra.gmra.mrb[2].mxu1 %vm2207_vm0, %v4143_v25 }
 0x30b   : > { %v2277_v32 = vpop.f32.mrb[0].mxu0  ;;  %v2348_v33 = vpop.f32.mrb[0].mxu1 }
 0x30c   : > { %v2279_v35 = vpop.f32.mrb[1].mxu0  ;;  %v2350_v36 = vpop.f32.mrb[1].mxu1 }
 0x30d   : > { %v2357_v37 = vcombine.low %v2277_v32, %v2279_v35  ;;  %v2358_v38 = vcombine.low %v2348_v33, %v2350_v36 }
 0x30f   : > { %v2365_v39 = vrot.slane %v2357_v37, %v2364_v34  ;;  %v2372_v40 = vrot.slane %v2358_v38, %v2364_v34  ;;  %v2459_v41 = vpop.f32.mrb[2].mxu0  ;;  %v2530_v42 = vpop.f32.mrb[2].mxu1 }
 0x310   : > { %v2461_v43 = vpop.f32.mrb[3].mxu0  ;;  %v2532_v44 = vpop.f32.mrb[3].mxu1 }
 0x311   : > { %v2373_v45 = vcombine.low %v2365_v39, %v2372_v40  ;;  %v2539_v46 = vcombine.low %v2459_v41, %v2461_v43  ;;  %v2540_v47 = vcombine.low %v2530_v42, %v2532_v44 }
 0x313   : > { %v2380_v49 = vrot.slane %v2373_v45, %v2364_v34  ;;  %v2547_v50 = vrot.slane %v2539_v46, %v2364_v34  ;;  %v2554_v51 = vrot.slane %v2540_v47, %v2364_v34 }
 0x315   : > { %v2382_v52 = vadd.f32 %v2380_v49, %v2206_v48  ;;  %v2555_v53 = vcombine.low %v2547_v50, %v2554_v51 }
 0x317   : > { %2387 = vst.msk [vmem:[#allocation2] sm:$0xf] %vm4340_vm1, %v2382_v52  ;;  %v2562_v55 = vrot.slane %v2555_v53, %v2364_v34 }
 0x319   : > { %v2564_v56 = vadd.f32 %v2562_v55, %v2388_v54 }
 0x31b   : > { %2565 = vst.msk [vmem:[#allocation3] sm:$0xf] %vm4340_vm1, %v2564_v56 }
 0x31e   : > { %v2569_v57 = vld [vmem:[#allocation2] sm:$0xf] }
 0x31f   : > { %v2570_v58 = vmul.f32 0.5, %v2569_v57 }
 0x321   : > { %v2573_v60 = vmul.f32 %v2570_v58, %v2570_v58 }
 0x322   : > { %v2571_v59 = vld [vmem:[#allocation3] sm:$0xf] }
 0x323   : > { %v2572_v61 = vmul.f32 0.5, %v2571_v59 }
 0x325   : > { %v2574_v62 = vsub.f32 %v2572_v61, %v2573_v60 }
 0x327   : > { %v2575_v63 = vmax.f32 %v2574_v62, 0.0 }
 0x329   : > { %v2577_v0 = vadd.f32 1e-05, %v2575_v63 }
 0x32b   : > { %3955 = vrsqrt.f32 %v2577_v0 }
 0x335   : > { %v3956_v2 = vpop.eup %3955 }
 0x336   : > { %v2579_v3 = vmul.f32 %v3956_v2, %v2576_v1 }
 0x338   : > { %2580 = vst.msk [vmem:[#allocation4] sm:$0xf] %vm4340_vm1, %v2579_v3  ;;  %v2582_v5 = vmul.f32 %v2579_v3, %v2570_v58 }
 0x33a   : > { %v2583_v6 = vsub.f32 %v2581_v4, %v2582_v5 }
 0x33c   : > { %2584 = vst.msk [vmem:[#allocation5] sm:$0xf] %vm4340_vm1, %v2583_v6 }
 0x33d PF: > { %p3383_p8 = scmp.ne.s32.totalorder %s4125_s21, 1 }
 0x33e   : > { %v3957_v7 = vld [vmem:[#allocation11 + $0x40] sm:$0xff] (!%p3383_p8)   ;;  %v3961_v13 = vld [vmem:[#allocation11 + $0x48] sm:$0xff] (!%p3383_p8)   ;;  %v3965_v20 = vld [vmem:[#allocation11 + $0x50] sm:$0xff] (!%p3383_p8)   ;;  %v2591_v31 = vlaneseq (!%p3383_p8) }
 0x33f   : > { %2588 = sbr.rel (%p3383_p8) target bundleno = 1084 (0x43c), region = 72  ;;  %v3958_v8 = vld [vmem:[#allocation11 + $0xc0] sm:$0xff] (!%p3383_p8)   ;;  %3421 = vmatprep.subr.bf16.mxu0 (!%p3383_p8), %v3957_v7  ;;  %v3962_v18 = vld [vmem:[#allocation11 + $0xc8] sm:$0xff] (!%p3383_p8)   ;;  %v3966_v12 = vld [vmem:[#allocation11 + $0xd0] sm:$0xff] (!%p3383_p8)  }
 0x340   : > { %v3959_v9 = vld [vmem:[#allocation11] sm:$0xff] (!%p3383_p8)   ;;  %3443 = vmatprep.subr.bf16.mxu1 (!%p3383_p8), %v3958_v8  ;;  %v3963_v19 = vld [vmem:[#allocation11 + $0x8] sm:$0xff] (!%p3383_p8)   ;;  %v3967_v21 = vld [vmem:[#allocation11 + $0x10] sm:$0xff] (!%p3383_p8)   ;;  %v2592_v36 = vshrl.u32 (!%p3383_p8), %v2591_v31, 7 }
 0x341   : > { %v3960_v10 = vld [vmem:[#allocation11 + $0x80] sm:$0xff] (!%p3383_p8)   ;;  %3422 = vmatpush3.bf16.msra.mxu0 (!%p3383_p8), %v3959_v9  ;;  %v3964_v11 = vld [vmem:[#allocation11 + $0x88] sm:$0xff] (!%p3383_p8)   ;;  %v3968_v22 = vld [vmem:[#allocation11 + $0x90] sm:$0xff] (!%p3383_p8)  }
 0x342   : > { %3444 = vmatpush3.bf16.msra.mxu1 (!%p3383_p8), %v3960_v10  ;;  %3423 = vmatprep.subr.bf16.mxu0 (!%p3383_p8), %v3961_v13  ;;  %v3969_v23 = vld [vmem:[#allocation11 + $0x58] sm:$0xff] (!%p3383_p8)   ;;  %v3973_v27 = vld [vmem:[#allocation11 + $0x60] sm:$0xff] (!%p3383_p8)   ;;  %v3977_v32 = vld [vmem:[#allocation11 + $0x68] sm:$0xff] (!%p3383_p8)   ;;  %v2597_v41 = vsub.s32 (!%p3383_p8), 1, %v2592_v36  ;;  %v2605_v43 = vsub.s32 (!%p3383_p8), 3, %v2592_v36  ;;  %v2593_v45 = vsub.s32 (!%p3383_p8), 0, %v2592_v36 }
 0x343   : > { %3445 = vmatprep.subr.bf16.mxu1 (!%p3383_p8), %v3962_v18  ;;  %v3970_v24 = vld [vmem:[#allocation11 + $0xd8] sm:$0xff] (!%p3383_p8)   ;;  %v3974_v28 = vld [vmem:[#allocation11 + $0xe0] sm:$0xff] (!%p3383_p8)   ;;  %v3978_v33 = vld [vmem:[#allocation11 + $0xe8] sm:$0xff] (!%p3383_p8)   ;;  %v2601_v47 = vsub.s32 (!%p3383_p8), 2, %v2592_v36 }
 0x344   : > { %v3971_v25 = vld [vmem:[#allocation11 + $0x18] sm:$0xff] (!%p3383_p8)   ;;  %v3975_v29 = vld [vmem:[#allocation11 + $0x20] sm:$0xff] (!%p3383_p8)   ;;  %v3979_v34 = vld [vmem:[#allocation11 + $0x28] sm:$0xff] (!%p3383_p8)  }
 0x345   : > { %3424 = vmatpush3.bf16.msra.mxu0 (!%p3383_p8), %v3963_v19  ;;  %v3972_v26 = vld [vmem:[#allocation11 + $0x98] sm:$0xff] (!%p3383_p8)   ;;  %v3976_v30 = vld [vmem:[#allocation11 + $0xa0] sm:$0xff] (!%p3383_p8)   ;;  %v3980_v35 = vld [vmem:[#allocation11 + $0xa8] sm:$0xff] (!%p3383_p8)  }
 0x346   : > { %3446 = vmatpush3.bf16.msra.mxu1 %v3964_v11  ;;  %3425 = vmatprep.subr.bf16.mxu0 %v3965_v20  ;;  %v3981_v37 = vld [vmem:[#allocation11 + $0x70] sm:$0xff]   ;;  %v3985_v42 = vld [vmem:[#allocation11 + $0x78] sm:$0xff]  }
 0x347   : > { %3447 = vmatprep.subr.bf16.mxu1 %v3966_v12  ;;  %v3982_v38 = vld [vmem:[#allocation11 + $0xf0] sm:$0xff]   ;;  %v3986_v44 = vld [vmem:[#allocation11 + $0xf8] sm:$0xff]  }
 0x348   : > { %v3983_v39 = vld [vmem:[#allocation11 + $0x30] sm:$0xff]   ;;  %v3987_v46 = vld [vmem:[#allocation11 + $0x38] sm:$0xff]  }
 0x349   : > { %3426 = vmatpush3.bf16.msra.mxu0 %v3967_v21  ;;  %v3984_v40 = vld [vmem:[#allocation11 + $0xb0] sm:$0xff]   ;;  %v3988_v48 = vld [vmem:[#allocation11 + $0xb8] sm:$0xff]  }
 0x34a   : > { %3448 = vmatpush3.bf16.msra.mxu1 %v3968_v22  ;;  %3427 = vmatprep.subr.bf16.mxu0 %v3969_v23  ;;  %v2589_v49 = vld [vmem:[#allocation4] sm:$0xf]  ;;  %v2615_v50 = vld [vmem:[#allocation5] sm:$0xf]  ;;  %v3384_v19 = vld [vmem:[%s4411_s5] ss:$0 sm:$0xff] }
 0x34b   : > { %3449 = vmatprep.subr.bf16.mxu1 %v3970_v24  ;;  %v2598_v51 = vrot.slane %v2589_v49, %v2597_v41  ;;  %v2624_v52 = vrot.slane %v2615_v50, %v2597_v41  ;;  %v2606_v53 = vrot.slane %v2589_v49, %v2605_v43  ;;  %v2632_v54 = vrot.slane %v2615_v50, %v2605_v43 }
 0x34c   : > { %v2594_v55 = vrot.slane %v2589_v49, %v2593_v45  ;;  %v2620_v56 = vrot.slane %v2615_v50, %v2593_v45  ;;  %v2602_v57 = vrot.slane %v2589_v49, %v2601_v47  ;;  %v2628_v58 = vrot.slane %v2615_v50, %v2601_v47 }
 0x34d   : > { %3428 = vmatpush3.bf16.msra.mxu0 %v3971_v25  ;;  %v2612_v59 = vmul.f32 %v2598_v51, %v4319_v16  ;;  %v2614_v60 = vmul.f32 %v2606_v53, %v4321_v17 }
 0x34e   : > { %3450 = vmatpush3.bf16.msra.mxu1 %v3972_v26  ;;  %3429 = vmatprep.subr.bf16.mxu0 %v3973_v27  ;;  %v2611_v61 = vmul.f32 %v2594_v55, %v4315_v14  ;;  %v2613_v62 = vmul.f32 %v2602_v57, %v4317_v15 }
 0x34f   : > { %3451 = vmatprep.subr.bf16.mxu1 %v3974_v28  ;;  %v2638_v63 = vadd.f32 %v2624_v52, %v2612_v59  ;;  %v2640_v0 = vadd.f32 %v2632_v54, %v2614_v60 }
 0x350   : > { %v2637_v1 = vadd.f32 %v2620_v56, %v2611_v61  ;;  %v2639_v2 = vadd.f32 %v2628_v58, %v2613_v62 }
 0x351   : > { %3430 = vmatpush3.bf16.msra.mxu0 %v3975_v29  ;;  %vm2642_vm2 = vcmp.ge.f32.partialorder %v2638_v63, 0.0  ;;  %v2646_v3 = vmul.f32 0.01, %v2638_v63  ;;  %vm2644_vm3 = vcmp.ge.f32.partialorder %v2640_v0, 0.0  ;;  %v2648_v4 = vmul.f32 0.01, %v2640_v0 }
 0x352   : > { %3452 = vmatpush3.bf16.msra.mxu1 %v3976_v30  ;;  %3431 = vmatprep.subr.bf16.mxu0 %v3977_v32  ;;  %vm2641_vm4 = vcmp.ge.f32.partialorder %v2637_v1, 0.0  ;;  %v2645_v5 = vmul.f32 0.01, %v2637_v1  ;;  %vm2643_vm5 = vcmp.ge.f32.partialorder %v2639_v2, 0.0  ;;  %v2647_v6 = vmul.f32 0.01, %v2639_v2 }
 0x353   : > { %3453 = vmatprep.subr.bf16.mxu1 %v3978_v33  ;;  %v2650_v7 = vsel %vm2642_vm2, %v2638_v63, %v2646_v3  ;;  %v2652_v16 = vsel %vm2644_vm3, %v2640_v0, %v2648_v4 }
 0x354   : > { %v2654_v8 = vpack.c.bf16 %v2650_v7, %v2650_v7  ;;  %v2656_v17 = vpack.c.bf16 %v2652_v16, %v2652_v16  ;;  %v2649_v9 = vsel %vm2641_vm4, %v2637_v1, %v2645_v5  ;;  %v2651_v14 = vsel %vm2643_vm5, %v2639_v2, %v2647_v6 }
 0x355   : > { %3432 = vmatpush3.bf16.msra.mxu0 %v3979_v34  ;;  %v2653_v10 = vpack.c.bf16 %v2649_v9, %v2649_v9  ;;  %v2655_v15 = vpack.c.bf16 %v2651_v14, %v2651_v14 }
 0x356   : > { %3454 = vmatpush3.bf16.msra.mxu1 %v3980_v35  ;;  %3433 = vmatprep.subr.bf16.mxu0 %v3981_v37 }
 0x357   : > { %3455 = vmatprep.subr.bf16.mxu1 %v3982_v38  ;;  %2952 = vmatprep.mubr.bf16.mxu0 %v2654_v8 }
 0x358   : > { %2992 = vmatprep.mubr.bf16.mxu1 %v2656_v17 }
 0x359   : > { %3434 = vmatpush3.bf16.msra.mxu0 %v3983_v39 }
 0x35a   : > { %3456 = vmatpush3.bf16.msra.mxu1 %v3984_v40  ;;  %3435 = vmatprep.subr.bf16.mxu0 %v3985_v42 }
 0x35b   : > { %3457 = vmatprep.subr.bf16.mxu1 %v3986_v44 }
 0x35d   : > { %3436 = vmatpush3.bf16.msra.mxu0 %v3987_v46 }
 0x35e   : > { %3458 = vmatpush3.bf16.msra.mxu1 %v3988_v48 }
 0x360   : > { %2953 = vmatmul.mubr.bf16.vlgmr.msra.gmra.mrb[0].mxu0 %v2653_v10 }
 0x361   : > { %2993 = vmatmul.mubr.bf16.vlgmr.msra.gmra.mrb[0].mxu1 %v2655_v15 }
 0x433   : > { %v3437_v13 = vpop.f32.mrb[0].mxu0 }
 0x434   : > { %v3459_v18 = vpop.f32.mrb[0].mxu1  ;;  %v3438_v11 = vpop.f32.mrb[1].mxu0 }
 0x435   : > { %v3460_v20 = vpop.f32.mrb[1].mxu1  ;;  %v3439_v12 = vadd.f32 %v3438_v11, %v3437_v13  ;;  %v3440_v22 = vpop.f32.mrb[2].mxu0 }
 0x436   : > { %v3461_v21 = vadd.f32 %v3460_v20, %v3459_v18  ;;  %v3462_v23 = vpop.f32.mrb[2].mxu1  ;;  %v3441_v24 = vpop.f32.mrb[3].mxu0 }
 0x437   : > { %v3463_v25 = vpop.f32.mrb[3].mxu1  ;;  %v2955_v26 = vadd.f32 %v3439_v12, %v3384_v19 }
 0x439   : > { %v2995_v27 = vadd.f32 %v3461_v21, %v2955_v26 }
 0x43b   : > { %3000 = vst [vmem:[#allocation12] sm:$0xff] %v2995_v27 }
 0x43c PF: > { %p4372_p6 = scmp.eq.s32.totalorder %s3104_s26, 1  ;;  %s4145_s19 = smov [#allocation12]  }
 0x43d   : > { %s3016_s20 = sshll.u32 %s4145_s19, 4  ;;  %s3017_s20 = int_to_ptr.vmem [resolvable:$true] %s3016_s20 }
 0x43e   : > { %s4073_s24 = scalar_lea.vmem %s3017_s20, 128  ;;  %s4079_s9 = scalar_lea.vmem %s3017_s20, 256 }
 0x43f   : > { %p4074_p9 = scmp.ne.s32.totalorder %s3017_s20, %s4073_s24  ;;  %p4080_p12 = scmp.lt.s32.totalorder %s3017_s20, %s3017_s20 }
 0x440   : > { %p4081_p13 = scmp.lt.s32.totalorder %s4079_s9, %s4073_s24 }
 0x441   : > { %p4075_p10 = pnand %p4074_p9, %p4372_p6 }
 0x442   : > { %p4082_p0 = por %p4081_p13, %p4080_p12 }
 0x443   : > { %p4076_p11 = pneg %p4075_p10 }
 0x445   : > { %p4083_p1 = pnand %p4082_p0, %p4076_p11 }
 0x447   : > { %4086 = shalt.err (!%p4083_p1)
}
 0x448   : > { %s4087_s13 = scalar_lea.hbm %s4412_s6, 128 }
 0x449   : > { %p4088_p4 = scmp.ne.s32.totalorder %s4412_s6, %s4087_s13  ;;  %p4093_p3 = scmp.lt.u32.totalorder %s4087_s13, %s4412_s6 }
 0x44b   : > { %p4089_p7 = pnand %p4088_p4, %p4372_p6 }
 0x44d   : > { %p4090_p2 = pneg %p4089_p7 }
 0x44f   : > { %p4095_p5 = pnand %p4093_p3, %p4090_p2 }
 0x451   : > { %4098 = shalt.err (!%p4095_p5)
}
 0x452   : > { %3502 = dma.vmem_to_hbm [thread:$0]  (%p4372_p6), %s3017_s20, 128, %s4412_s6, [#allocation8]  }
 0x453 PF: > { %p3526_p8 = scmp.ge.s32.totalorder %s4133_s23, 2  ;;  %s4427_s18 = sadd.s32 4294967294, %s4133_s23  }
 0x454   : > { %p3527_p9 = scmp.eq.s32.totalorder %s4427_s18, 1 }
 0x456   : > { %p3516_p10 = pnand %p3527_p9, %p3526_p8 }
 0x458   : > { %4120 = dma.done.wait (!%p3516_p10), [#allocation8], 128  }
 0x459   : > { %4122 = vsyncadd (!%p3516_p10), [#allocation8], 4294967168  ;;  %s21_s23 = sadd.s32 1, %s4133_s23   ;;  %s4428_s21 = smov %s4129_s22 }
 0x45a   : > { %p18_p11 = scmp.ge.s32.totalorder %s21_s23, 4   ;;  %s4429_s22 = smov %s4431_s7 }
 0x45c   :  { %20 = sbr.rel (!%p18_p11) target bundleno = 5 (0x5), region = 106 }
 0x463   :  { %3034 = vsyncpa [#allocation7], 1 }
 0x464   :  { %3036 = vsyncpa [#allocation7 + $0x1], 1 }
 0x465   :  { %3037 = vsyncpa [#allocation10], 1 }
 0x466   :  { %3038 = vsyncpa [#allocation8], 1 }
 0x467   :  { %3040 = vsyncpa [#allocation8 + $0x1], 1 }

</bundles_post_ra>
